<compile_context>
chip_gen: v7x
topology: tpu7x:2x2x1
jax: 0.10.0
libtpu: 0.0.40
codegen_flags: <defaults>
</compile_context>

<pallas_src>
import functools
import math

import jax
import jax.numpy as jnp
from jax.experimental import pallas as pl
from jax.experimental.pallas import tpu as pltpu

_INV_SQRT2 = 0.7071067811865476       # 1 / sqrt(2)
_SQRT_2_OVER_PI = 0.7978845608028654  # sqrt(2 / pi)
_GELU_TANH_C = 0.044715


def _gelu_exact(x):
    # PyTorch nn.GELU() default: exact erf-based GELU (heavier on the VALU slot).
    return 0.5 * x * (1.0 + jax.lax.erf(x * _INV_SQRT2))


def _gelu_tanh(x):
    # tanh approximation; the transcendental goes to the EUP slot instead of the VALU.
    inner = _SQRT_2_OVER_PI * (x + _GELU_TANH_C * (x * x * x))
    return 0.5 * x * (1.0 + jnp.tanh(inner))


def _mlp_kernel(x_ref, w1_ref, b1_ref, w2_ref, b2_ref, o_ref, *, gelu_fn):
    # One batch tile per grid step; both matmuls + bias + GELU fused in VMEM
    # (the hidden activation never touches HBM).
    x = x_ref[...]                                                     # (tm, 256)
    h = jnp.dot(x, w1_ref[...], preferred_element_type=jnp.float32)   # (tm, H), f32 accumulate
    h = gelu_fn(h + b1_ref[...])                                       # bias + GELU in f32
    h = h.astype(w2_ref.dtype)                                         # feed MXU in weight dtype
    y = jnp.dot(h, w2_ref[...], preferred_element_type=jnp.float32)   # (tm, 256), f32 accumulate
    y = gelu_fn(y + b2_ref[...])                                       # module applies GELU after fnn2
    o_ref[...] = y.astype(o_ref.dtype)


def _round_up(n, m):
    return ((n + m - 1) // m) * m


def mlp_forward(x, w1, b1, w2, b2, *, tm=512, mxu_dtype=jnp.bfloat16, gelu="tanh",
                mxu_align=256):
    """Fused MLP forward (eval mode: dropout is identity).

    tm:        max batch-tile rows per grid step (512 amortizes per-step overhead; the tile
               is capped so the grid keeps >=2 steps for v7x's two TensorCores).
    mxu_dtype: dtype fed to the MXU (default bf16 on all generations; None = f32 matmuls).
               Accumulation, bias add and GELU math always stay float32.
    gelu:      "tanh" (EUP-friendly approximation, default) or "exact" (PyTorch erf numerics).
    """
    B, D_in = x.shape
    D_hid = w1.shape[1]
    D_out = w2.shape[1]
    out_dtype = x.dtype

    if mxu_dtype is not None:
        x = x.astype(mxu_dtype)
        w1 = w1.astype(mxu_dtype)
        w2 = w2.astype(mxu_dtype)
    b1 = b1.astype(jnp.float32).reshape(1, D_hid)
    b2 = b2.astype(jnp.float32).reshape(1, D_out)

    # Pad only to a sublane multiple (<= 7 rows) — never to a multiple of the tile.
    B_pad = _round_up(B, 8)
    if B_pad != B:
        x = jnp.pad(x, ((0, B_pad - B), (0, 0)))

    if B_pad <= tm:
        tm_eff = B_pad                      # single tile covering the whole (padded) batch
    else:
        # Keep at least 2 tiles so both v7x TensorCores get work; MXU-align when possible.
        tm_eff = min(tm, _round_up(pl.cdiv(B_pad, 2), 8))
        aligned = _round_up(tm_eff, mxu_align)
        if aligned <= tm and aligned <= B_pad:
            tm_eff = aligned
    grid = (pl.cdiv(B_pad, tm_eff),)        # ragged last tile handled by masked OOB writes

    gelu_fn = _gelu_exact if gelu == "exact" else _gelu_tanh
    kernel = functools.partial(_mlp_kernel, gelu_fn=gelu_fn)

    out = pl.pallas_call(
        kernel,
        out_shape=jax.ShapeDtypeStruct((B_pad, D_out), out_dtype),
        grid=grid,
        in_specs=[
            pl.BlockSpec((tm_eff, D_in), lambda i: (i, 0)),   # streaming x tile
            pl.BlockSpec((D_in, D_hid), lambda i: (0, 0)),    # W1 (grid-invariant, stays resident)
            pl.BlockSpec((1, D_hid), lambda i: (0, 0)),       # b1
            pl.BlockSpec((D_hid, D_out), lambda i: (0, 0)),   # W2
            pl.BlockSpec((1, D_out), lambda i: (0, 0)),       # b2
        ],
        out_specs=pl.BlockSpec((tm_eff, D_out), lambda i: (i, 0)),
        compiler_params=pltpu.CompilerParams(
            # Batch tiles are independent -> shard across v7x's two TensorCores.
            dimension_semantics=("parallel",),
        ),
    )(x, w1, b1, w2, b2)

    return out[:B] if B_pad != B else out


def init_linear(key, fan_in, fan_out, dtype=jnp.float32):
    # PyTorch nn.Linear default init: U(-1/sqrt(fan_in), 1/sqrt(fan_in)).
    kw, kb = jax.random.split(key)
    bound = 1.0 / math.sqrt(fan_in)
    # Stored as (in, out) so the kernel does x @ W (== PyTorch x @ W.T).
    w = jax.random.uniform(kw, (fan_in, fan_out), dtype, -bound, bound)
    b = jax.random.uniform(kb, (1, fan_out), dtype, -bound, bound)
    return w, b


def mlp_reference(x, w1, b1, w2, b2):
    # Pure-JAX eval-mode reference with PyTorch-default exact GELU.
    h = _gelu_exact(x @ w1 + b1)
    y = _gelu_exact(h @ w2 + b2)
    return y


if __name__ == "__main__":
    key = jax.random.PRNGKey(0)
    k_x, k_l1, k_l2 = jax.random.split(key, 3)

    B = 64          # small batch
    D_IN = 256      # nn.Linear(256, hidden_output)
    HIDDEN = 1024   # hidden_output default
    D_OUT = 256     # nn.Linear(hidden_output, 256)

    x = jax.random.normal(k_x, (B, D_IN), jnp.float32)
    w1, b1 = init_linear(k_l1, D_IN, HIDDEN)
    w2, b2 = init_linear(k_l2, HIDDEN, D_OUT)

    ref = mlp_reference(x, w1, b1, w2, b2)

    # 1) Exact path (f32 MXU + erf GELU): matches PyTorch f32 numerics tightly.
    out_exact = jax.block_until_ready(
        mlp_forward(x, w1, b1, w2, b2, mxu_dtype=None, gelu="exact"))
    assert out_exact.shape == (B, D_OUT)
    assert jnp.allclose(out_exact, ref, atol=1e-4, rtol=1e-4), "exact-path mismatch vs reference"

    # 2) Default fast path (bf16 MXU inputs + tanh GELU): looser tolerance by design.
    out_fast = jax.block_until_ready(mlp_forward(x, w1, b1, w2, b2))
    assert jnp.allclose(out_fast, ref, atol=5e-2, rtol=5e-2), "fast-path mismatch vs reference"

    # 3) Batch not a multiple of 8: exercises the (tiny) sublane-padding path.
    out_odd = jax.block_until_ready(mlp_forward(x[:37], w1, b1, w2, b2))
    assert out_odd.shape == (37, D_OUT)
    assert jnp.allclose(out_odd, ref[:37], atol=5e-2, rtol=5e-2), "ragged-batch mismatch"

    # 4) Multi-tile grid with a partial last tile (cdiv grid + masked OOB writes).
    x_big = jax.random.normal(k_x, (160, D_IN), jnp.float32)
    ref_big = mlp_reference(x_big, w1, b1, w2, b2)
    out_big = jax.block_until_ready(mlp_forward(x_big, w1, b1, w2, b2, tm=64))
    assert out_big.shape == (160, D_OUT)
    assert jnp.allclose(out_big, ref_big, atol=5e-2, rtol=5e-2), "multi-tile mismatch"

    print("KERNEL_OK")
</pallas_src>

<mosaic_0001>
module attributes {stable_mosaic.version = 11 : i64} {
  func.func @_mlp_kernel(%arg0: i32, %arg1: memref<64x256xf32, #tpu.memory_space<vmem>>, %arg2: memref<256x1024xf32, #tpu.memory_space<vmem>>, %arg3: memref<1x1024xf32, #tpu.memory_space<vmem>>, %arg4: memref<1024x256xf32, #tpu.memory_space<vmem>>, %arg5: memref<1x256xf32, #tpu.memory_space<vmem>>, %arg6: memref<64x256xf32, #tpu.memory_space<vmem>>) attributes {dimension_semantics = [#tpu.dimension_semantics<parallel>], iteration_bounds = array<i64: 1>, scalar_prefetch = 0 : i64, scratch_operands = 0 : i64, tpu.core_type = #tpu.core_type<tc>, window_params = [{transform_indices = @transform_0, window_bounds = array<i64: 64, 256>}, {pipeline_mode = #tpu.pipeline_mode<synchronous>, transform_indices = @transform_1, window_bounds = array<i64: 256, 1024>}, {pipeline_mode = #tpu.pipeline_mode<synchronous>, transform_indices = @transform_2, window_bounds = array<i64: 1, 1024>}, {pipeline_mode = #tpu.pipeline_mode<synchronous>, transform_indices = @transform_3, window_bounds = array<i64: 1024, 256>}, {pipeline_mode = #tpu.pipeline_mode<synchronous>, transform_indices = @transform_4, window_bounds = array<i64: 1, 256>}, {transform_indices = @transform_5, window_bounds = array<i64: 64, 256>}]} {
    %c0 = arith.constant 0 : index
    %c0_0 = arith.constant 0 : index
    %0 = vector.load %arg1[%c0, %c0_0] : memref<64x256xf32, #tpu.memory_space<vmem>>, vector<64x256xf32>
    %c0_1 = arith.constant 0 : index
    %c0_2 = arith.constant 0 : index
    %1 = vector.load %arg2[%c0_1, %c0_2] : memref<256x1024xf32, #tpu.memory_space<vmem>>, vector<256x1024xf32>
    %cst = arith.constant dense<0.000000e+00> : vector<64x1024xf32>
    %2 = tpu.matmul %0, %1, %cst {dimension_numbers = #tpu.dot_dimension_numbers<[1], [0], [0], [1], [0, 0, 1, 1], [], []>} : vector<64x256xf32>, vector<256x1024xf32>, vector<64x1024xf32> -> vector<64x1024xf32>
    %c0_3 = arith.constant 0 : index
    %c0_4 = arith.constant 0 : index
    %3 = vector.load %arg3[%c0_3, %c0_4] : memref<1x1024xf32, #tpu.memory_space<vmem>>, vector<1x1024xf32>
    %4 = vector.broadcast %3 : vector<1x1024xf32> to vector<64x1024xf32>
    %5 = arith.addf %2, %4 : vector<64x1024xf32>
    %cst_5 = arith.constant 5.000000e-01 : f32
    %6 = vector.broadcast %cst_5 : f32 to vector<64x1024xf32>
    %7 = arith.mulf %6, %5 : vector<64x1024xf32>
    %cst_6 = arith.constant 0.707106769 : f32
    %8 = vector.broadcast %cst_6 : f32 to vector<64x1024xf32>
    %9 = arith.mulf %5, %8 : vector<64x1024xf32>
    %10 = math.erf %9 : vector<64x1024xf32>
    %cst_7 = arith.constant 1.000000e+00 : f32
    %11 = vector.broadcast %cst_7 : f32 to vector<64x1024xf32>
    %12 = arith.addf %11, %10 : vector<64x1024xf32>
    %13 = arith.mulf %7, %12 : vector<64x1024xf32>
    %c0_8 = arith.constant 0 : index
    %c0_9 = arith.constant 0 : index
    %14 = vector.load %arg4[%c0_8, %c0_9] : memref<1024x256xf32, #tpu.memory_space<vmem>>, vector<1024x256xf32>
    %cst_10 = arith.constant dense<0.000000e+00> : vector<64x256xf32>
    %15 = tpu.matmul %13, %14, %cst_10 {dimension_numbers = #tpu.dot_dimension_numbers<[1], [0], [0], [1], [0, 0, 1, 1], [], []>} : vector<64x1024xf32>, vector<1024x256xf32>, vector<64x256xf32> -> vector<64x256xf32>
    %c0_11 = arith.constant 0 : index
    %c0_12 = arith.constant 0 : index
    %16 = vector.load %arg5[%c0_11, %c0_12] : memref<1x256xf32, #tpu.memory_space<vmem>>, vector<1x256xf32>
    %17 = vector.broadcast %16 : vector<1x256xf32> to vector<64x256xf32>
    %18 = arith.addf %15, %17 : vector<64x256xf32>
    %cst_13 = arith.constant 5.000000e-01 : f32
    %19 = vector.broadcast %cst_13 : f32 to vector<64x256xf32>
    %20 = arith.mulf %19, %18 : vector<64x256xf32>
    %cst_14 = arith.constant 0.707106769 : f32
    %21 = vector.broadcast %cst_14 : f32 to vector<64x256xf32>
    %22 = arith.mulf %18, %21 : vector<64x256xf32>
    %23 = math.erf %22 : vector<64x256xf32>
    %cst_15 = arith.constant 1.000000e+00 : f32
    %24 = vector.broadcast %cst_15 : f32 to vector<64x256xf32>
    %25 = arith.addf %24, %23 : vector<64x256xf32>
    %26 = arith.mulf %20, %25 : vector<64x256xf32>
    %c0_16 = arith.constant 0 : index
    %c0_17 = arith.constant 0 : index
    %27 = vector.load %arg6[%c0_16, %c0_17] : memref<64x256xf32, #tpu.memory_space<vmem>>, vector<64x256xf32>
    tpu.vector_store %arg6[%c0_16, %c0_17], %26 {strides = array<i32>} : memref<64x256xf32, #tpu.memory_space<vmem>>, vector<64x256xf32>,
    return
  }
  func.func @transform_0(%arg0: i32) -> (i32, i32) {
    %c0_i32 = arith.constant 0 : i32
    %c0_i32_0 = arith.constant 0 : i32
    return %arg0, %c0_i32 : i32, i32
  }
  func.func @transform_1(%arg0: i32) -> (i32, i32) {
    %c0_i32 = arith.constant 0 : i32
    %c0_i32_0 = arith.constant 0 : i32
    %c0_i32_1 = arith.constant 0 : i32
    return %c0_i32, %c0_i32_0 : i32, i32
  }
  func.func @transform_2(%arg0: i32) -> (i32, i32) {
    %c0_i32 = arith.constant 0 : i32
    %c0_i32_0 = arith.constant 0 : i32
    %c0_i32_1 = arith.constant 0 : i32
    return %c0_i32, %c0_i32_0 : i32, i32
  }
  func.func @transform_3(%arg0: i32) -> (i32, i32) {
    %c0_i32 = arith.constant 0 : i32
    %c0_i32_0 = arith.constant 0 : i32
    %c0_i32_1 = arith.constant 0 : i32
    return %c0_i32, %c0_i32_0 : i32, i32
  }
  func.func @transform_4(%arg0: i32) -> (i32, i32) {
    %c0_i32 = arith.constant 0 : i32
    %c0_i32_0 = arith.constant 0 : i32
    %c0_i32_1 = arith.constant 0 : i32
    return %c0_i32, %c0_i32_0 : i32, i32
  }
  func.func @transform_5(%arg0: i32) -> (i32, i32) {
    %c0_i32 = arith.constant 0 : i32
    %c0_i32_0 = arith.constant 0 : i32
    return %arg0, %c0_i32 : i32, i32
  }
}

</mosaic_0001>

<bundles_post_ra>
// kernel: tpu_custom_call.1
= control target key start
LH: loop header
LB: loop body
LE: loop exit
PB: predicated region body
PF: predicated region fallthrough
CT: control target
= control target key end

     0   :  { %10 = vsyncpa [#allocation3], 0  ;;  %s3363_s0 = inlined_call_operand.hbm [shape: f32[64,256], index: 0, kind: input, shape index: {}]   ;;  %s3364_s1 = inlined_call_operand.hbm [shape: f32[256,1024], index: 1, kind: input, shape index: {}]   ;;  %s3365_s2 = inlined_call_operand.hbm [shape: f32[1,1024], index: 2, kind: input, shape index: {}]   ;;  %s3366_s3 = inlined_call_operand.hbm [shape: f32[1024,256], index: 3, kind: input, shape index: {}]   ;;  %s3367_s4 = inlined_call_operand.vmem [shape: f32[1,256], index: 4, kind: input, shape index: {}]   ;;  %s3368_s5 = inlined_call_operand.hbm [shape: f32[64,256], index: 5, kind: output, shape index: {}]  }
   0x1   :  { %11 = vsyncpa [#allocation6], 0 }
   0x2   :  { %12 = vsyncpa [#allocation9], 0 }
   0x3   :  { %13 = vsyncpa [#allocation4], 0  ;;  %s2875_s18 = smov [#allocation5]   ;;  %s2757_s22 = scalar_lea.hbm %s3364_s1, 32768 }
   0x4   :  { %s31_s19 = sshll.u32 %s2875_s18, 4  ;;  %p2758_p0 = scmp.ne.s32.totalorder %s3364_s1, %s2757_s22  ;;  %s32_s19 = int_to_ptr.vmem [resolvable:$true] %s31_s19 }
   0x5   :  { %p2761_p1 = scmp.lt.u32.totalorder %s2757_s22, %s3364_s1 }
   0x7   :  { %p2763_p2 = pnand %p2761_p1, %p2758_p0 }
   0x9   :  { %2766 = shalt.err (!%p2763_p2)
}
   0xa   :  { %s2767_s27 = scalar_lea.vmem %s32_s19, 32768  ;;  %p2772_p4 = scmp.lt.s32.totalorder %s32_s19, %s32_s19 }
   0xb   :  { %p2768_p3 = scmp.ne.s32.totalorder %s32_s19, %s2767_s27  ;;  %p2773_p5 = scmp.lt.s32.totalorder %s2767_s27, %s2767_s27 }
   0xd   :  { %p2774_p6 = por %p2773_p5, %p2772_p4 }
   0xf   :  { %p2775_p7 = pnand %p2774_p6, %p2768_p3 }
  0x11   :  { %2778 = shalt.err (!%p2775_p7)
}
  0x12   :  { %s2876_s28 = smov 1024   ;;  %s2877_s29 = smov 64  }
  0x13   :  { %37 = dma.hbm_to_vmem [thread:$0]  %s3364_s1, 32768, %s32_s19, [#allocation6], %s2876_s28, %s2876_s28, %s2877_s29  }
  0x14   :  { %s2878_s7 = smov [#allocation2]   ;;  %s2779_s11 = scalar_lea.hbm %s3363_s0, 2048 }
  0x15   :  { %s19_s8 = sshll.u32 %s2878_s7, 4  ;;  %p2780_p8 = scmp.ne.s32.totalorder %s3363_s0, %s2779_s11  ;;  %s20_s8 = int_to_ptr.vmem [resolvable:$true] %s19_s8 }
  0x16   :  { %p2783_p9 = scmp.lt.u32.totalorder %s2779_s11, %s3363_s0 }
  0x18   :  { %p2785_p10 = pnand %p2783_p9, %p2780_p8 }
  0x1a   :  { %2788 = shalt.err (!%p2785_p10)
}
  0x1b   :  { %s2789_s16 = scalar_lea.vmem %s20_s8, 2048  ;;  %p2794_p12 = scmp.lt.s32.totalorder %s20_s8, %s20_s8 }
  0x1c   :  { %p2790_p11 = scmp.ne.s32.totalorder %s20_s8, %s2789_s16  ;;  %p2795_p13 = scmp.lt.s32.totalorder %s2789_s16, %s2789_s16 }
  0x1e   :  { %p2796_p0 = por %p2795_p13, %p2794_p12 }
  0x20   :  { %p2797_p1 = pnand %p2796_p0, %p2790_p11 }
  0x22   :  { %2800 = shalt.err (!%p2797_p1)
}
  0x23   :  { %s2879_s1 = smov 256   ;;  %s2880_s17 = smov 16  }
  0x24   :  { %25 = dma.hbm_to_vmem [thread:$0]  %s3363_s0, 2048, %s20_s8, [#allocation3], %s2879_s1, %s2879_s1, %s2880_s17  }
  0x25   :  { %s2881_s20 = smov [#allocation7]   ;;  %s2882_s22 = smov [#allocation8]  }
  0x26   :  { %s44_s21 = sshll.u32 %s2881_s20, 4  ;;  %s53_s23 = sshll.u32 %s2882_s22, 4  ;;  %s45_s21 = int_to_ptr.vmem [resolvable:$true] %s44_s21  ;;  %s2941_s23 = int_to_ptr.vmem [resolvable:$true] %s53_s23 }
  0x27   :  { %s2801_s26 = scalar_lea.hbm %s3365_s2, 128 }
  0x28   :  { %p2802_p2 = scmp.ne.s32.totalorder %s3365_s2, %s2801_s26  ;;  %p2805_p3 = scmp.lt.u32.totalorder %s2801_s26, %s3365_s2 }
  0x2a   :  { %p2807_p4 = pnand %p2805_p3, %p2802_p2 }
  0x2c   :  { %2810 = shalt.err (!%p2807_p4)
}
  0x2d   :  { %s2811_s0 = scalar_lea.vmem %s45_s21, 128  ;;  %p2816_p6 = scmp.lt.s32.totalorder %s45_s21, %s45_s21 }
  0x2e   :  { %p2812_p5 = scmp.ne.s32.totalorder %s45_s21, %s2811_s0  ;;  %p2817_p7 = scmp.lt.s32.totalorder %s2811_s0, %s2811_s0 }
  0x30   :  { %p2818_p8 = por %p2817_p7, %p2816_p6 }
  0x32   :  { %p2819_p9 = pnand %p2818_p8, %p2812_p5 }
  0x34   :  { %2822 = shalt.err (!%p2819_p9)
}
  0x35   :  { %47 = dma.hbm_to_vmem [thread:$0]  %s3365_s2, 128, %s45_s21, [#allocation6]  }
  0x36   :  { %s2823_s10 = scalar_lea.hbm %s3366_s3, 32768 }
  0x37   :  { %p2824_p10 = scmp.ne.s32.totalorder %s3366_s3, %s2823_s10  ;;  %p2827_p11 = scmp.lt.u32.totalorder %s2823_s10, %s3366_s3 }
  0x39   :  { %p2829_p12 = pnand %p2827_p11, %p2824_p10 }
  0x3b   :  { %2832 = shalt.err (!%p2829_p12)
}
  0x3c   :  { %s2833_s15 = scalar_lea.vmem %s2941_s23, 32768  ;;  %p2838_p0 = scmp.lt.s32.totalorder %s2941_s23, %s2941_s23 }
  0x3d   :  { %p2834_p13 = scmp.ne.s32.totalorder %s2941_s23, %s2833_s15  ;;  %p2839_p1 = scmp.lt.s32.totalorder %s2833_s15, %s2833_s15 }
  0x3f   :  { %p2840_p2 = por %p2839_p1, %p2838_p0 }
  0x41   :  { %p2841_p3 = pnand %p2840_p2, %p2834_p13 }
  0x43   :  { %2844 = shalt.err (!%p2841_p3)
}
  0x44   :  { %59 = dma.hbm_to_vmem [thread:$0]  %s3366_s3, 32768, %s2941_s23, [#allocation9], %s2879_s1, %s2879_s1, %s2880_s17  }
  0x45   :  { %2867 = dma.done.wait [#allocation3], 2048  }
  0x46   :  { %2868 = vsyncadd [#allocation3], 4294965248 }
  0x47   :  { %2869 = dma.done.wait [#allocation6], 32896  }
  0x48   :  { %2870 = vsyncadd [#allocation6], 4294934400 }
  0x49   :  { %2871 = dma.done.wait [#allocation9], 32768  }
  0x4a   :  { %2872 = vsyncadd [#allocation9], 4294934528  ;;  %v91_v0 = vld [vmem:[#allocation5 + $0x8] sm:$0xff]  ;;  %v90_v2 = vld [vmem:[#allocation5] sm:$0xff] }
  0x4b   :  { %v99_v1 = vld [vmem:[#allocation5 + $0x48] sm:$0xff]  ;;  %v98_v4 = vld [vmem:[#allocation5 + $0x40] sm:$0xff] }
  0x4c   :  { %v1995_v3 = vpack.c.bf16 %v99_v1, %v91_v0  ;;  %v107_v5 = vld [vmem:[#allocation5 + $0x88] sm:$0xff]  ;;  %v1997_v7 = vpack.c.bf16 %v98_v4, %v90_v2  ;;  %v106_v9 = vld [vmem:[#allocation5 + $0x80] sm:$0xff] }
  0x4d   :  { %v115_v6 = vld [vmem:[#allocation5 + $0xc8] sm:$0xff]  ;;  %v114_v10 = vld [vmem:[#allocation5 + $0xc0] sm:$0xff] }
  0x4e   :  { %v1999_v8 = vpack.c.bf16 %v115_v6, %v107_v5  ;;  %v123_v11 = vld [vmem:[#allocation5 + $0x108] sm:$0xff]  ;;  %1996 = vmatprep.subr.bf16.mxu1 %v1995_v3  ;;  %v2001_v13 = vpack.c.bf16 %v114_v10, %v106_v9  ;;  %v122_v15 = vld [vmem:[#allocation5 + $0x100] sm:$0xff] }
  0x4f   :  { %v131_v12 = vld [vmem:[#allocation5 + $0x148] sm:$0xff]  ;;  %1998 = vmatpush1.bf16.msra.mxu1 %v1997_v7  ;;  %v130_v16 = vld [vmem:[#allocation5 + $0x140] sm:$0xff] }
  0x50   :  { %2000 = vmatprep.subr.bf16.mxu1 %v1999_v8  ;;  %v2003_v14 = vpack.c.bf16 %v131_v12, %v123_v11  ;;  %v139_v17 = vld [vmem:[#allocation5 + $0x188] sm:$0xff]  ;;  %v2005_v19 = vpack.c.bf16 %v130_v16, %v122_v15  ;;  %v138_v21 = vld [vmem:[#allocation5 + $0x180] sm:$0xff] }
  0x51   :  { %v147_v18 = vld [vmem:[#allocation5 + $0x1c8] sm:$0xff]  ;;  %v146_v22 = vld [vmem:[#allocation5 + $0x1c0] sm:$0xff] }
  0x52   :  { %v2007_v20 = vpack.c.bf16 %v147_v18, %v139_v17  ;;  %v155_v23 = vld [vmem:[#allocation5 + $0x208] sm:$0xff]  ;;  %v2009_v25 = vpack.c.bf16 %v146_v22, %v138_v21  ;;  %v154_v27 = vld [vmem:[#allocation5 + $0x200] sm:$0xff] }
  0x53   :  { %2002 = vmatpush1.bf16.msra.mxu1 %v2001_v13  ;;  %v163_v24 = vld [vmem:[#allocation5 + $0x248] sm:$0xff]  ;;  %v162_v28 = vld [vmem:[#allocation5 + $0x240] sm:$0xff] }
  0x54   :  { %2004 = vmatprep.subr.bf16.mxu1 %v2003_v14  ;;  %v2011_v26 = vpack.c.bf16 %v163_v24, %v155_v23  ;;  %v171_v29 = vld [vmem:[#allocation5 + $0x288] sm:$0xff]  ;;  %v2013_v31 = vpack.c.bf16 %v162_v28, %v154_v27  ;;  %v170_v33 = vld [vmem:[#allocation5 + $0x280] sm:$0xff] }
  0x55   :  { %v179_v30 = vld [vmem:[#allocation5 + $0x2c8] sm:$0xff]  ;;  %v178_v34 = vld [vmem:[#allocation5 + $0x2c0] sm:$0xff] }
  0x56   :  { %v2015_v32 = vpack.c.bf16 %v179_v30, %v171_v29  ;;  %v187_v35 = vld [vmem:[#allocation5 + $0x308] sm:$0xff]  ;;  %v2017_v37 = vpack.c.bf16 %v178_v34, %v170_v33  ;;  %v186_v39 = vld [vmem:[#allocation5 + $0x300] sm:$0xff]  ;;  %v101_v33 = vld [vmem:[#allocation5 + $0x58] sm:$0xff] }
  0x57   :  { %2006 = vmatpush1.bf16.msra.mxu1 %v2005_v19  ;;  %v195_v36 = vld [vmem:[#allocation5 + $0x348] sm:$0xff]  ;;  %v194_v40 = vld [vmem:[#allocation5 + $0x340] sm:$0xff] }
  0x58   :  { %2008 = vmatprep.subr.bf16.mxu1 %v2007_v20  ;;  %v2019_v38 = vpack.c.bf16 %v195_v36, %v187_v35  ;;  %v2975_v41 = vld [vmem:[#allocation2 + $0x8] sm:$0xff]  ;;  %v2021_v44 = vpack.c.bf16 %v194_v40, %v186_v39  ;;  %v202_v46 = vld [vmem:[#allocation5 + $0x380] sm:$0xff]  ;;  %v92_v36 = vld [vmem:[#allocation5 + $0x10] sm:$0xff] }
  0x59   :  { %v203_v42 = vld [vmem:[#allocation5 + $0x388] sm:$0xff]  ;;  %452 = vmatprep.mubr.f32.mxu1 %v2975_v41  ;;  %v210_v47 = vld [vmem:[#allocation5 + $0x3c0] sm:$0xff]  ;;  %v117_v39 = vld [vmem:[#allocation5 + $0xd8] sm:$0xff] }
  0x5a   :  { %v211_v43 = vld [vmem:[#allocation5 + $0x3c8] sm:$0xff]  ;;  %v2025_v50 = vpack.c.bf16 %v210_v47, %v202_v46  ;;  %v218_v52 = vld [vmem:[#allocation5 + $0x400] sm:$0xff]  ;;  %v2980_v46 = vld [vmem:[#allocation2 + $0x18] sm:$0xff] }
  0x5b   :  { %2010 = vmatpush1.bf16.msra.mxu1 %v2009_v25  ;;  %v2023_v45 = vpack.c.bf16 %v211_v43, %v203_v42  ;;  %v219_v48 = vld [vmem:[#allocation5 + $0x408] sm:$0xff]  ;;  %v226_v53 = vld [vmem:[#allocation5 + $0x440] sm:$0xff]  ;;  %v125_v47 = vld [vmem:[#allocation5 + $0x118] sm:$0xff] }
  0x5c   :  { %2012 = vmatprep.subr.bf16.mxu1 %v2011_v26  ;;  %v227_v49 = vld [vmem:[#allocation5 + $0x448] sm:$0xff]  ;;  %v2029_v56 = vpack.c.bf16 %v226_v53, %v218_v52  ;;  %v234_v58 = vld [vmem:[#allocation5 + $0x480] sm:$0xff]  ;;  %v124_v52 = vld [vmem:[#allocation5 + $0x110] sm:$0xff] }
  0x5d   :  { %v2027_v51 = vpack.c.bf16 %v227_v49, %v219_v48  ;;  %v235_v54 = vld [vmem:[#allocation5 + $0x488] sm:$0xff]  ;;  %v242_v59 = vld [vmem:[#allocation5 + $0x4c0] sm:$0xff]  ;;  %v133_v48 = vld [vmem:[#allocation5 + $0x158] sm:$0xff] }
  0x5e   :  { %v243_v55 = vld [vmem:[#allocation5 + $0x4c8] sm:$0xff]  ;;  %v2033_v62 = vpack.c.bf16 %v242_v59, %v234_v58  ;;  %v250_v0 = vld [vmem:[#allocation5 + $0x500] sm:$0xff]  ;;  %v132_v53 = vld [vmem:[#allocation5 + $0x150] sm:$0xff] }
  0x5f   :  { %2014 = vmatpush1.bf16.msra.mxu1 %v2013_v31  ;;  %v2031_v57 = vpack.c.bf16 %v243_v55, %v235_v54  ;;  %v251_v60 = vld [vmem:[#allocation5 + $0x508] sm:$0xff]  ;;  %v258_v1 = vld [vmem:[#allocation5 + $0x540] sm:$0xff]  ;;  %v141_v55 = vld [vmem:[#allocation5 + $0x198] sm:$0xff] }
  0x60   :  { %2016 = vmatprep.subr.bf16.mxu1 %v2015_v32  ;;  %v259_v61 = vld [vmem:[#allocation5 + $0x548] sm:$0xff]  ;;  %v2037_v4 = vpack.c.bf16 %v258_v1, %v250_v0  ;;  %v266_v6 = vld [vmem:[#allocation5 + $0x580] sm:$0xff]  ;;  %v93_v32 = vld [vmem:[#allocation5 + $0x18] sm:$0xff] }
  0x61   :  { %v2035_v63 = vpack.c.bf16 %v259_v61, %v251_v60  ;;  %v267_v2 = vld [vmem:[#allocation5 + $0x588] sm:$0xff]  ;;  %v274_v7 = vld [vmem:[#allocation5 + $0x5c0] sm:$0xff]  ;;  %v2059_v35 = vpack.c.bf16 %v101_v33, %v93_v32  ;;  %v140_v60 = vld [vmem:[#allocation5 + $0x190] sm:$0xff] }
  0x62   :  { %v275_v3 = vld [vmem:[#allocation5 + $0x5c8] sm:$0xff]  ;;  %v2041_v10 = vpack.c.bf16 %v274_v7, %v266_v6  ;;  %v282_v12 = vld [vmem:[#allocation5 + $0x600] sm:$0xff]  ;;  %v148_v61 = vld [vmem:[#allocation5 + $0x1d0] sm:$0xff] }
  0x63   :  { %2018 = vmatpush1.bf16.msra.mxu1 %v2017_v37  ;;  %v2039_v5 = vpack.c.bf16 %v275_v3, %v267_v2  ;;  %v283_v8 = vld [vmem:[#allocation5 + $0x608] sm:$0xff]  ;;  %v290_v13 = vld [vmem:[#allocation5 + $0x640] sm:$0xff]  ;;  %v100_v37 = vld [vmem:[#allocation5 + $0x50] sm:$0xff]  ;;  %v2073_v1 = vpack.c.bf16 %v148_v61, %v140_v60 }
  0x64   :  { %2020 = vmatprep.subr.bf16.mxu1 %v2019_v38  ;;  %v291_v9 = vld [vmem:[#allocation5 + $0x648] sm:$0xff]  ;;  %v2045_v16 = vpack.c.bf16 %v290_v13, %v282_v12  ;;  %v298_v18 = vld [vmem:[#allocation5 + $0x680] sm:$0xff]  ;;  %v109_v38 = vld [vmem:[#allocation5 + $0x98] sm:$0xff]  ;;  %v2061_v42 = vpack.c.bf16 %v100_v37, %v92_v36 }
  0x65   :  { %v2043_v11 = vpack.c.bf16 %v291_v9, %v283_v8  ;;  %v299_v14 = vld [vmem:[#allocation5 + $0x688] sm:$0xff]  ;;  %v306_v19 = vld [vmem:[#allocation5 + $0x6c0] sm:$0xff]  ;;  %v2063_v43 = vpack.c.bf16 %v117_v39, %v109_v38  ;;  %v165_v0 = vld [vmem:[#allocation5 + $0x258] sm:$0xff] }
  0x66   :  { %v307_v15 = vld [vmem:[#allocation5 + $0x6c8] sm:$0xff]  ;;  %v2049_v22 = vpack.c.bf16 %v306_v19, %v298_v18  ;;  %v314_v24 = vld [vmem:[#allocation5 + $0x700] sm:$0xff]  ;;  %v2996_v2 = vld [vmem:[#allocation2 + $0x30] sm:$0xff] }
  0x67   :  { %2022 = vmatpush1.bf16.msra.mxu1 %v2021_v44  ;;  %v2047_v17 = vpack.c.bf16 %v307_v15, %v299_v14  ;;  %v315_v20 = vld [vmem:[#allocation5 + $0x708] sm:$0xff]  ;;  %v322_v25 = vld [vmem:[#allocation5 + $0x740] sm:$0xff]  ;;  %v108_v44 = vld [vmem:[#allocation5 + $0x90] sm:$0xff] }
  0x68   :  { %2024 = vmatprep.subr.bf16.mxu1 %v2023_v45  ;;  %v323_v21 = vld [vmem:[#allocation5 + $0x748] sm:$0xff]  ;;  %v2053_v28 = vpack.c.bf16 %v322_v25, %v314_v24  ;;  %v330_v30 = vld [vmem:[#allocation5 + $0x780] sm:$0xff]  ;;  %v116_v45 = vld [vmem:[#allocation5 + $0xd0] sm:$0xff] }
  0x69   :  { %v2051_v23 = vpack.c.bf16 %v323_v21, %v315_v20  ;;  %v331_v26 = vld [vmem:[#allocation5 + $0x788] sm:$0xff]  ;;  %v338_v31 = vld [vmem:[#allocation5 + $0x7c0] sm:$0xff]  ;;  %v2065_v49 = vpack.c.bf16 %v116_v45, %v108_v44  ;;  %v173_v7 = vld [vmem:[#allocation5 + $0x298] sm:$0xff] }
  0x6a   :  { %v339_v27 = vld [vmem:[#allocation5 + $0x7c8] sm:$0xff]  ;;  %v2057_v34 = vpack.c.bf16 %v338_v31, %v330_v30  ;;  %v2978_v40 = vld [vmem:[#allocation2] sm:$0xff]  ;;  %v181_v8 = vld [vmem:[#allocation5 + $0x2d8] sm:$0xff] }
  0x6b   :  { %2026 = vmatpush1.bf16.msra.mxu1 %v2025_v50  ;;  %v2055_v29 = vpack.c.bf16 %v339_v27, %v331_v26  ;;  %v2984_v50 = vld [vmem:[#allocation2 + $0x10] sm:$0xff]  ;;  %v2986_v54 = vld [vmem:[#allocation2 + $0x28] sm:$0xff]  ;;  %v2990_v58 = vld [vmem:[#allocation2 + $0x20] sm:$0xff] }
  0x6c   :  { %2028 = vmatprep.subr.bf16.mxu1 %v2027_v51  ;;  %v2067_v51 = vpack.c.bf16 %v133_v48, %v125_v47  ;;  %v2998_v6 = vld [vmem:[#allocation2 + $0x48] sm:$0xff]  ;;  %v172_v12 = vld [vmem:[#allocation5 + $0x290] sm:$0xff]  ;;  %v3004_v14 = vld [vmem:[#allocation2 + $0x58] sm:$0xff] }
  0x6d   :  { %v180_v13 = vld [vmem:[#allocation5 + $0x2d0] sm:$0xff]  ;;  %v189_v15 = vld [vmem:[#allocation5 + $0x318] sm:$0xff]  ;;  %v3014_v26 = vld [vmem:[#allocation2 + $0x60] sm:$0xff] }
  0x6e   :  { %v3008_v18 = vld [vmem:[#allocation2 + $0x50] sm:$0xff]  ;;  %v213_v24 = vld [vmem:[#allocation5 + $0x3d8] sm:$0xff] }
  0x6f   :  { %2030 = vmatpush1.bf16.msra.mxu1 %v2029_v56  ;;  %v149_v56 = vld [vmem:[#allocation5 + $0x1d8] sm:$0xff]  ;;  %v188_v20 = vld [vmem:[#allocation5 + $0x310] sm:$0xff] }
  0x70   :  { %2032 = vmatprep.subr.bf16.mxu1 %v2031_v57  ;;  %v2069_v57 = vpack.c.bf16 %v132_v53, %v124_v52  ;;  %v2071_v59 = vpack.c.bf16 %v149_v56, %v141_v55  ;;  %v196_v21 = vld [vmem:[#allocation5 + $0x350] sm:$0xff]  ;;  %v3016_v30 = vld [vmem:[#allocation2 + $0x78] sm:$0xff] }
  0x71   :  { %v2085_v25 = vpack.c.bf16 %v196_v21, %v188_v20  ;;  %v221_v31 = vld [vmem:[#allocation5 + $0x418] sm:$0xff]  ;;  %v220_v36 = vld [vmem:[#allocation5 + $0x410] sm:$0xff]  ;;  %v1164_v20 = vld [vmem:[#allocation8 + $0x20] sm:$0xff] }
  0x72   :  { %v229_v32 = vld [vmem:[#allocation5 + $0x458] sm:$0xff]  ;;  %v228_v37 = vld [vmem:[#allocation5 + $0x450] sm:$0xff] }
  0x73   :  { %2034 = vmatpush1.bf16.msra.mxu1 %v2033_v62  ;;  %v2992_v62 = vld [vmem:[#allocation2 + $0x38] sm:$0xff]  ;;  %v236_v44 = vld [vmem:[#allocation5 + $0x490] sm:$0xff] }
  0x74   :  { %2036 = vmatprep.subr.bf16.mxu1 %v2035_v63  ;;  %v157_v63 = vld [vmem:[#allocation5 + $0x218] sm:$0xff]  ;;  %v244_v45 = vld [vmem:[#allocation5 + $0x4d0] sm:$0xff] }
  0x75   :  { %v2075_v3 = vpack.c.bf16 %v165_v0, %v157_v63  ;;  %v237_v38 = vld [vmem:[#allocation5 + $0x498] sm:$0xff]  ;;  %v252_v52 = vld [vmem:[#allocation5 + $0x510] sm:$0xff] }
  0x76   :  { %v245_v39 = vld [vmem:[#allocation5 + $0x4d8] sm:$0xff]  ;;  %v260_v53 = vld [vmem:[#allocation5 + $0x550] sm:$0xff] }
  0x77   :  { %2038 = vmatpush1.bf16.msra.mxu1 %v2037_v4  ;;  %v156_v4 = vld [vmem:[#allocation5 + $0x210] sm:$0xff]  ;;  %v253_v47 = vld [vmem:[#allocation5 + $0x518] sm:$0xff] }
  0x78   :  { %2040 = vmatprep.subr.bf16.mxu1 %v2039_v5  ;;  %v164_v5 = vld [vmem:[#allocation5 + $0x250] sm:$0xff]  ;;  %v261_v48 = vld [vmem:[#allocation5 + $0x558] sm:$0xff] }
  0x79   :  { %v2077_v9 = vpack.c.bf16 %v164_v5, %v156_v4  ;;  %v269_v55 = vld [vmem:[#allocation5 + $0x598] sm:$0xff]  ;;  %v276_v60 = vld [vmem:[#allocation5 + $0x5d0] sm:$0xff]  ;;  %v1160_v4 = vld [vmem:[#allocation8] sm:$0xff] }
  0x7a   :  { %v277_v56 = vld [vmem:[#allocation5 + $0x5d8] sm:$0xff] }
  0x7b   :  { %2042 = vmatpush1.bf16.msra.mxu1 %v2041_v10  ;;  %v3002_v10 = vld [vmem:[#allocation2 + $0x40] sm:$0xff]  ;;  %v2103_v61 = vpack.c.bf16 %v277_v56, %v269_v55  ;;  %v285_v63 = vld [vmem:[#allocation5 + $0x618] sm:$0xff] }
  0x7c   :  { %2044 = vmatprep.subr.bf16.mxu1 %v2043_v11  ;;  %v2079_v11 = vpack.c.bf16 %v181_v8, %v173_v7  ;;  %v293_v0 = vld [vmem:[#allocation5 + $0x658] sm:$0xff] }
  0x7d   :  { %v1162_v5 = vld [vmem:[#allocation8 + $0x10] sm:$0xff] }
  0x7e   :  { %v2253_v8 = vpack.c.bf16 %v1162_v5, %v1160_v4  ;;  %v1166_v21 = vld [vmem:[#allocation8 + $0x30] sm:$0xff]  ;;  %v1176_v4 = vld [vmem:[#allocation8 + $0x80] sm:$0xff] }
  0x7f   :  { %2046 = vmatpush1.bf16.msra.mxu1 %v2045_v16  ;;  %v197_v16 = vld [vmem:[#allocation5 + $0x358] sm:$0xff] }
  0x80   :  { %2048 = vmatprep.subr.bf16.mxu1 %v2047_v17  ;;  %v2081_v17 = vpack.c.bf16 %v180_v13, %v172_v12  ;;  %v2083_v19 = vpack.c.bf16 %v197_v16, %v189_v15  ;;  %v292_v12 = vld [vmem:[#allocation5 + $0x650] sm:$0xff]  ;;  %v2107_v13 = vpack.c.bf16 %v293_v0, %v285_v63  ;;  %v301_v15 = vld [vmem:[#allocation5 + $0x698] sm:$0xff]  ;;  %v95_v63 = vld [vmem:[#allocation5 + $0x28] sm:$0xff] }
  0x81   :  { %v309_v16 = vld [vmem:[#allocation5 + $0x6d8] sm:$0xff]  ;;  %v103_v0 = vld [vmem:[#allocation5 + $0x68] sm:$0xff] }
  0x82   :  { %v1178_v5 = vld [vmem:[#allocation8 + $0x90] sm:$0xff] }
  0x83   :  { %2050 = vmatpush1.bf16.msra.mxu1 %v2049_v22  ;;  %v3010_v22 = vld [vmem:[#allocation2 + $0x68] sm:$0xff] }
  0x84   :  { %2052 = vmatprep.subr.bf16.mxu1 %v2051_v23  ;;  %v205_v23 = vld [vmem:[#allocation5 + $0x398] sm:$0xff] }
  0x85   :  { %v2087_v27 = vpack.c.bf16 %v213_v24, %v205_v23  ;;  %v2257_v24 = vpack.c.bf16 %v1166_v21, %v1164_v20  ;;  %v1180_v20 = vld [vmem:[#allocation8 + $0xa0] sm:$0xff]  ;;  %v1182_v21 = vld [vmem:[#allocation8 + $0xb0] sm:$0xff] }
  0x87   :  { %2054 = vmatpush1.bf16.msra.mxu1 %v2053_v28  ;;  %v204_v28 = vld [vmem:[#allocation5 + $0x390] sm:$0xff] }
  0x88   :  { %2056 = vmatprep.subr.bf16.mxu1 %v2055_v29  ;;  %v212_v29 = vld [vmem:[#allocation5 + $0x3d0] sm:$0xff] }
  0x89   :  { %v2089_v33 = vpack.c.bf16 %v212_v29, %v204_v28  ;;  %v308_v28 = vld [vmem:[#allocation5 + $0x6d0] sm:$0xff]  ;;  %v2111_v29 = vpack.c.bf16 %v309_v16, %v301_v15  ;;  %v111_v15 = vld [vmem:[#allocation5 + $0xa8] sm:$0xff] }
  0x8a   :  { %v119_v16 = vld [vmem:[#allocation5 + $0xe8] sm:$0xff] }
  0x8b   :  { %2058 = vmatpush1.bf16.msra.mxu1 %v2057_v34  ;;  %v3020_v34 = vld [vmem:[#allocation2 + $0x70] sm:$0xff] }
  0x8c   :  { %2060 = vmatprep.subr.bf16.mxu1 %v2059_v35  ;;  %v2091_v35 = vpack.c.bf16 %v229_v32, %v221_v31  ;;  %v317_v31 = vld [vmem:[#allocation5 + $0x718] sm:$0xff] }
  0x8d   :  { %v325_v32 = vld [vmem:[#allocation5 + $0x758] sm:$0xff] }
  0x8e   :  { %453 = vmatmul.mubr.f32.vlgmr.msra.gmra.mrb[0].mxu1 %v2978_v40 }
  0x8f   :  { %2062 = vmatpush1.bf16.msra.mxu1 %v2061_v42  ;;  %458 = vmatprep.mubr.f32.mxu1 %v2980_v46  ;;  %v2093_v42 = vpack.c.bf16 %v228_v37, %v220_v36  ;;  %v1168_v36 = vld [vmem:[#allocation8 + $0x40] sm:$0xff]  ;;  %v1170_v37 = vld [vmem:[#allocation8 + $0x50] sm:$0xff] }
  0x90   :  { %2064 = vmatprep.subr.bf16.mxu1 %v2063_v43  ;;  %v2095_v43 = vpack.c.bf16 %v245_v39, %v237_v38  ;;  %v2261_v39 = vpack.c.bf16 %v1170_v37, %v1168_v36  ;;  %v1184_v37 = vld [vmem:[#allocation8 + $0xc0] sm:$0xff] }
  0x92   :  { %459 = vmatmul.mubr.f32.gmra.mrb[2].mxu1 %v2984_v50 }
  0x93   :  { %2066 = vmatpush1.bf16.msra.mxu1 %v2065_v49  ;;  %464 = vmatprep.mubr.f32.mxu1 %v2986_v54  ;;  %v2097_v49 = vpack.c.bf16 %v244_v45, %v236_v44  ;;  %v324_v44 = vld [vmem:[#allocation5 + $0x750] sm:$0xff]  ;;  %v2115_v45 = vpack.c.bf16 %v325_v32, %v317_v31  ;;  %v127_v31 = vld [vmem:[#allocation5 + $0x128] sm:$0xff] }
  0x94   :  { %2068 = vmatprep.subr.bf16.mxu1 %v2067_v51  ;;  %v2099_v51 = vpack.c.bf16 %v261_v48, %v253_v47  ;;  %v333_v47 = vld [vmem:[#allocation5 + $0x798] sm:$0xff]  ;;  %v1185_v32 = vld [vmem:[#allocation8 + $0xc8] sm:$0xff] }
  0x95   :  { %v341_v48 = vld [vmem:[#allocation5 + $0x7d8] sm:$0xff] }
  0x96   :  { %465 = vmatmul.mubr.f32.gmra.mrb[4].mxu1 %v2990_v58 }
  0x97   :  { %2070 = vmatpush1.bf16.msra.mxu1 %v2069_v57  ;;  %470 = vmatprep.mubr.f32.mxu1 %v2992_v62  ;;  %v2101_v57 = vpack.c.bf16 %v260_v53, %v252_v52  ;;  %v1172_v52 = vld [vmem:[#allocation8 + $0x60] sm:$0xff]  ;;  %v1174_v53 = vld [vmem:[#allocation8 + $0x70] sm:$0xff] }
  0x98   :  { %2072 = vmatprep.subr.bf16.mxu1 %v2071_v59  ;;  %v268_v59 = vld [vmem:[#allocation5 + $0x590] sm:$0xff]  ;;  %v2265_v56 = vpack.c.bf16 %v1174_v53, %v1172_v52  ;;  %v1188_v53 = vld [vmem:[#allocation8 + $0xe0] sm:$0xff] }
  0x9a   :  { %471 = vmatmul.mubr.f32.gmra.mrb[6].mxu1 %v2996_v2 }
  0x9b   :  { %2074 = vmatpush1.bf16.msra.mxu1 %v2073_v1  ;;  %476 = vmatprep.mubr.f32.mxu1 %v2998_v6  ;;  %v1161_v1 = vld [vmem:[#allocation8 + $0x8] sm:$0xff] }
  0x9c   :  { %2076 = vmatprep.subr.bf16.mxu1 %v2075_v3  ;;  %v1163_v3 = vld [vmem:[#allocation8 + $0x18] sm:$0xff] }
  0x9d   :  { %v2251_v7 = vpack.c.bf16 %v1163_v3, %v1161_v1  ;;  %v1177_v1 = vld [vmem:[#allocation8 + $0x88] sm:$0xff]  ;;  %v1179_v3 = vld [vmem:[#allocation8 + $0x98] sm:$0xff] }
  0x9e   :  { %477 = vmatmul.mubr.f32.gmra.mrb[8].mxu1 %v3002_v10 }
  0x9f   :  { %2078 = vmatpush1.bf16.msra.mxu1 %v2077_v9  ;;  %482 = vmatprep.mubr.f32.mxu1 %v3004_v14  ;;  %v2105_v9 = vpack.c.bf16 %v276_v60, %v268_v59  ;;  %v332_v59 = vld [vmem:[#allocation5 + $0x790] sm:$0xff] }
  0xa0   :  { %2080 = vmatprep.subr.bf16.mxu1 %v2079_v11  ;;  %v284_v11 = vld [vmem:[#allocation5 + $0x610] sm:$0xff]  ;;  %2252 = vmatprep.subr.bf16.mxu0 %v2251_v7  ;;  %v2267_v7 = vpack.c.bf16 %v1179_v3, %v1177_v1  ;;  %v1195_v1 = vld [vmem:[#allocation8 + $0x118] sm:$0xff]  ;;  %v167_v3 = vld [vmem:[#allocation5 + $0x268] sm:$0xff] }
  0xa1   :  { %2254 = vmatpush1.bf16.msra.mxu0 %v2253_v8  ;;  %v340_v60 = vld [vmem:[#allocation5 + $0x7d0] sm:$0xff]  ;;  %v2269_v8 = vpack.c.bf16 %v1178_v5, %v1176_v4  ;;  %v1192_v5 = vld [vmem:[#allocation8 + $0x100] sm:$0xff] }
  0xa2   :  { %483 = vmatmul.mubr.f32.gmra.mrb[10].mxu1 %v3008_v18 }
  0xa3   :  { %2082 = vmatpush1.bf16.msra.mxu1 %v2081_v17  ;;  %488 = vmatprep.mubr.f32.mxu1 %v3010_v22  ;;  %v1165_v17 = vld [vmem:[#allocation8 + $0x28] sm:$0xff] }
  0xa4   :  { %2084 = vmatprep.subr.bf16.mxu1 %v2083_v19  ;;  %v1167_v19 = vld [vmem:[#allocation8 + $0x38] sm:$0xff] }
  0xa5   :  { %v2255_v23 = vpack.c.bf16 %v1167_v19, %v1165_v17  ;;  %v1181_v17 = vld [vmem:[#allocation8 + $0xa8] sm:$0xff]  ;;  %v1183_v19 = vld [vmem:[#allocation8 + $0xb8] sm:$0xff] }
  0xa6   :  { %489 = vmatmul.mubr.f32.gmra.mrb[12].mxu1 %v3014_v26 }
  0xa7   :  { %2086 = vmatpush1.bf16.msra.mxu1 %v2085_v25  ;;  %494 = vmatprep.mubr.f32.mxu1 %v3016_v30  ;;  %v2109_v25 = vpack.c.bf16 %v292_v12, %v284_v11  ;;  %v94_v11 = vld [vmem:[#allocation5 + $0x20] sm:$0xff] }
  0xa8   :  { %2088 = vmatprep.subr.bf16.mxu1 %v2087_v27  ;;  %v300_v27 = vld [vmem:[#allocation5 + $0x690] sm:$0xff]  ;;  %2256 = vmatprep.subr.bf16.mxu0 %v2255_v23  ;;  %v102_v12 = vld [vmem:[#allocation5 + $0x60] sm:$0xff]  ;;  %v2271_v23 = vpack.c.bf16 %v1183_v19, %v1181_v17  ;;  %v183_v19 = vld [vmem:[#allocation5 + $0x2e8] sm:$0xff] }
  0xa9   :  { %2258 = vmatpush1.bf16.msra.mxu0 %v2257_v24  ;;  %v2273_v24 = vpack.c.bf16 %v1182_v21, %v1180_v20  ;;  %v1199_v17 = vld [vmem:[#allocation8 + $0x138] sm:$0xff]  ;;  %v1196_v21 = vld [vmem:[#allocation8 + $0x120] sm:$0xff] }
  0xaa   :  { %495 = vmatmul.mubr.f32.gmra.mrb[14].mxu1 %v3020_v34 }
  0xab   :  { %2090 = vmatpush1.bf16.msra.mxu1 %v2089_v33  ;;  %565 = vmatprep.mubr.f32.mxu1 %v2975_v41  ;;  %v1169_v33 = vld [vmem:[#allocation8 + $0x48] sm:$0xff] }
  0xac   :  { %2092 = vmatprep.subr.bf16.mxu1 %v2091_v35  ;;  %v1171_v35 = vld [vmem:[#allocation8 + $0x58] sm:$0xff] }
  0xad   :  { %v2259_v38 = vpack.c.bf16 %v1171_v35, %v1169_v33  ;;  %v1187_v33 = vld [vmem:[#allocation8 + $0xd8] sm:$0xff]  ;;  %v135_v35 = vld [vmem:[#allocation5 + $0x168] sm:$0xff] }
  0xae   :  { %v2275_v36 = vpack.c.bf16 %v1187_v33, %v1185_v32  ;;  %v1201_v32 = vld [vmem:[#allocation8 + $0x148] sm:$0xff]  ;;  %v1203_v33 = vld [vmem:[#allocation8 + $0x158] sm:$0xff] }
  0xaf   :  { %2094 = vmatpush1.bf16.msra.mxu1 %v2093_v42  ;;  %v2113_v42 = vpack.c.bf16 %v308_v28, %v300_v27  ;;  %2260 = vmatprep.subr.bf16.mxu0 %v2259_v38  ;;  %v110_v27 = vld [vmem:[#allocation5 + $0xa0] sm:$0xff]  ;;  %v1186_v38 = vld [vmem:[#allocation8 + $0xd0] sm:$0xff] }
  0xb0   :  { %2096 = vmatprep.subr.bf16.mxu1 %v2095_v43  ;;  %v316_v43 = vld [vmem:[#allocation5 + $0x710] sm:$0xff]  ;;  %2262 = vmatpush1.bf16.msra.mxu0 %v2261_v39  ;;  %v118_v28 = vld [vmem:[#allocation5 + $0xe0] sm:$0xff]  ;;  %v2277_v39 = vpack.c.bf16 %v1186_v38, %v1184_v37  ;;  %v1200_v37 = vld [vmem:[#allocation8 + $0x140] sm:$0xff] }
  0xb1   :  { %v1202_v38 = vld [vmem:[#allocation8 + $0x150] sm:$0xff] }
  0xb3   :  { %2098 = vmatpush1.bf16.msra.mxu1 %v2097_v49  ;;  %v1173_v49 = vld [vmem:[#allocation8 + $0x68] sm:$0xff] }
  0xb4   :  { %2100 = vmatprep.subr.bf16.mxu1 %v2099_v51  ;;  %v1175_v51 = vld [vmem:[#allocation8 + $0x78] sm:$0xff] }
  0xb5   :  { %v2263_v55 = vpack.c.bf16 %v1175_v51, %v1173_v49  ;;  %v1191_v49 = vld [vmem:[#allocation8 + $0xf8] sm:$0xff]  ;;  %v151_v51 = vld [vmem:[#allocation5 + $0x1e8] sm:$0xff] }
  0xb7   :  { %2102 = vmatpush1.bf16.msra.mxu1 %v2101_v57  ;;  %v2117_v57 = vpack.c.bf16 %v324_v44, %v316_v43  ;;  %2264 = vmatprep.subr.bf16.mxu0 %v2263_v55  ;;  %v126_v43 = vld [vmem:[#allocation5 + $0x120] sm:$0xff]  ;;  %v1190_v55 = vld [vmem:[#allocation8 + $0xf0] sm:$0xff] }
  0xb8   :  { %2104 = vmatprep.subr.bf16.mxu1 %v2103_v61  ;;  %v2119_v61 = vpack.c.bf16 %v341_v48, %v333_v47  ;;  %2266 = vmatpush1.bf16.msra.mxu0 %v2265_v56  ;;  %v134_v44 = vld [vmem:[#allocation5 + $0x160] sm:$0xff]  ;;  %v143_v47 = vld [vmem:[#allocation5 + $0x1a8] sm:$0xff]  ;;  %v1189_v48 = vld [vmem:[#allocation8 + $0xe8] sm:$0xff]  ;;  %v2281_v56 = vpack.c.bf16 %v1190_v55, %v1188_v53 }
  0xb9   :  { %2268 = vmatprep.subr.bf16.mxu0 %v2267_v7  ;;  %v2279_v52 = vpack.c.bf16 %v1191_v49, %v1189_v48  ;;  %v1194_v7 = vld [vmem:[#allocation8 + $0x110] sm:$0xff]  ;;  %v1205_v48 = vld [vmem:[#allocation8 + $0x168] sm:$0xff]  ;;  %v1207_v49 = vld [vmem:[#allocation8 + $0x178] sm:$0xff] }
  0xba   :  { %v1204_v53 = vld [vmem:[#allocation8 + $0x160] sm:$0xff]  ;;  %v1206_v55 = vld [vmem:[#allocation8 + $0x170] sm:$0xff] }
  0xbb   :  { %2106 = vmatpush1.bf16.msra.mxu1 %v2105_v9  ;;  %v2121_v9 = vpack.c.bf16 %v340_v60, %v332_v59  ;;  %v142_v59 = vld [vmem:[#allocation5 + $0x1a0] sm:$0xff] }
  0xbc   :  { %2108 = vmatprep.subr.bf16.mxu1 %v2107_v13  ;;  %v2123_v13 = vpack.c.bf16 %v103_v0, %v95_v63  ;;  %2270 = vmatpush1.bf16.msra.mxu0 %v2269_v8  ;;  %v150_v60 = vld [vmem:[#allocation5 + $0x1e0] sm:$0xff]  ;;  %v159_v63 = vld [vmem:[#allocation5 + $0x228] sm:$0xff]  ;;  %v1193_v0 = vld [vmem:[#allocation8 + $0x108] sm:$0xff]  ;;  %v2285_v8 = vpack.c.bf16 %v1194_v7, %v1192_v5 }
  0xbd   :  { %2272 = vmatprep.subr.bf16.mxu0 %v2271_v23  ;;  %v2283_v4 = vpack.c.bf16 %v1195_v1, %v1193_v0  ;;  %v1198_v23 = vld [vmem:[#allocation8 + $0x130] sm:$0xff]  ;;  %v1209_v0 = vld [vmem:[#allocation8 + $0x188] sm:$0xff]  ;;  %v1211_v1 = vld [vmem:[#allocation8 + $0x198] sm:$0xff] }
  0xbe   :  { %v1208_v5 = vld [vmem:[#allocation8 + $0x180] sm:$0xff]  ;;  %v1210_v7 = vld [vmem:[#allocation8 + $0x190] sm:$0xff] }
  0xbf   :  { %2110 = vmatpush1.bf16.msra.mxu1 %v2109_v25  ;;  %v2125_v25 = vpack.c.bf16 %v102_v12, %v94_v11  ;;  %v158_v11 = vld [vmem:[#allocation5 + $0x220] sm:$0xff] }
  0xc0   :  { %2112 = vmatprep.subr.bf16.mxu1 %v2111_v29  ;;  %v2127_v29 = vpack.c.bf16 %v119_v16, %v111_v15  ;;  %2274 = vmatpush1.bf16.msra.mxu0 %v2273_v24  ;;  %v166_v12 = vld [vmem:[#allocation5 + $0x260] sm:$0xff]  ;;  %v175_v15 = vld [vmem:[#allocation5 + $0x2a8] sm:$0xff]  ;;  %v1197_v16 = vld [vmem:[#allocation8 + $0x128] sm:$0xff]  ;;  %v2289_v24 = vpack.c.bf16 %v1198_v23, %v1196_v21 }
  0xc1   :  { %2276 = vmatprep.subr.bf16.mxu0 %v2275_v36  ;;  %v2287_v20 = vpack.c.bf16 %v1199_v17, %v1197_v16  ;;  %v2291_v36 = vpack.c.bf16 %v1203_v33, %v1201_v32  ;;  %v1213_v16 = vld [vmem:[#allocation8 + $0x1a8] sm:$0xff]  ;;  %v1215_v17 = vld [vmem:[#allocation8 + $0x1b8] sm:$0xff]  ;;  %v1212_v21 = vld [vmem:[#allocation8 + $0x1a0] sm:$0xff] }
  0xc2   :  { %v1214_v23 = vld [vmem:[#allocation8 + $0x1b0] sm:$0xff]  ;;  %v1217_v32 = vld [vmem:[#allocation8 + $0x1c8] sm:$0xff]  ;;  %v1219_v33 = vld [vmem:[#allocation8 + $0x1d8] sm:$0xff] }
  0xc3   :  { %2114 = vmatpush1.bf16.msra.mxu1 %v2113_v42  ;;  %v2129_v42 = vpack.c.bf16 %v118_v28, %v110_v27  ;;  %v174_v27 = vld [vmem:[#allocation5 + $0x2a0] sm:$0xff] }
  0xc4   :  { %2116 = vmatprep.subr.bf16.mxu1 %v2115_v45  ;;  %v2131_v45 = vpack.c.bf16 %v135_v35, %v127_v31  ;;  %2278 = vmatpush1.bf16.msra.mxu0 %v2277_v39  ;;  %v182_v28 = vld [vmem:[#allocation5 + $0x2e0] sm:$0xff]  ;;  %v191_v31 = vld [vmem:[#allocation5 + $0x328] sm:$0xff]  ;;  %v2293_v39 = vpack.c.bf16 %v1202_v38, %v1200_v37  ;;  %v1218_v38 = vld [vmem:[#allocation8 + $0x1d0] sm:$0xff] }
  0xc5   :  { %2280 = vmatprep.subr.bf16.mxu0 %v2279_v52  ;;  %v199_v35 = vld [vmem:[#allocation5 + $0x368] sm:$0xff]  ;;  %v2295_v52 = vpack.c.bf16 %v1207_v49, %v1205_v48  ;;  %v1223_v48 = vld [vmem:[#allocation8 + $0x1f8] sm:$0xff] }
  0xc6   :  { %v1216_v37 = vld [vmem:[#allocation8 + $0x1c0] sm:$0xff] }
  0xc7   :  { %2118 = vmatpush1.bf16.msra.mxu1 %v2117_v57  ;;  %v2133_v57 = vpack.c.bf16 %v134_v44, %v126_v43  ;;  %v190_v43 = vld [vmem:[#allocation5 + $0x320] sm:$0xff]  ;;  %v279_v49 = vld [vmem:[#allocation5 + $0x5e8] sm:$0xff] }
  0xc8   :  { %2120 = vmatprep.subr.bf16.mxu1 %v2119_v61  ;;  %v2135_v61 = vpack.c.bf16 %v151_v51, %v143_v47  ;;  %2282 = vmatpush1.bf16.msra.mxu0 %v2281_v56  ;;  %v198_v44 = vld [vmem:[#allocation5 + $0x360] sm:$0xff]  ;;  %v207_v47 = vld [vmem:[#allocation5 + $0x3a8] sm:$0xff]  ;;  %v2297_v56 = vpack.c.bf16 %v1206_v55, %v1204_v53  ;;  %v1222_v53 = vld [vmem:[#allocation8 + $0x1f0] sm:$0xff] }
  0xc9   :  { %2284 = vmatprep.subr.bf16.mxu0 %v2283_v4  ;;  %v215_v51 = vld [vmem:[#allocation5 + $0x3e8] sm:$0xff]  ;;  %v2299_v4 = vpack.c.bf16 %v1211_v1, %v1209_v0 }
  0xca   :  { %v287_v0 = vld [vmem:[#allocation5 + $0x628] sm:$0xff] }
  0xcb   :  { %2122 = vmatpush1.bf16.msra.mxu1 %v2121_v9  ;;  %v2137_v9 = vpack.c.bf16 %v150_v60, %v142_v59  ;;  %v206_v59 = vld [vmem:[#allocation5 + $0x3a0] sm:$0xff]  ;;  %v295_v1 = vld [vmem:[#allocation5 + $0x668] sm:$0xff] }
  0xcc   :  { %2124 = vmatprep.subr.bf16.mxu1 %v2123_v13  ;;  %v2139_v13 = vpack.c.bf16 %v167_v3, %v159_v63  ;;  %2286 = vmatpush1.bf16.msra.mxu0 %v2285_v8  ;;  %v214_v60 = vld [vmem:[#allocation5 + $0x3e0] sm:$0xff]  ;;  %v223_v63 = vld [vmem:[#allocation5 + $0x428] sm:$0xff]  ;;  %v2301_v8 = vpack.c.bf16 %v1210_v7, %v1208_v5  ;;  %v2171_v5 = vpack.c.bf16 %v295_v1, %v287_v0  ;;  %v169_v0 = vld [vmem:[#allocation5 + $0x278] sm:$0xff] }
  0xcd   :  { %2288 = vmatprep.subr.bf16.mxu0 %v2287_v20  ;;  %v231_v3 = vld [vmem:[#allocation5 + $0x468] sm:$0xff]  ;;  %v2303_v20 = vpack.c.bf16 %v1215_v17, %v1213_v16  ;;  %v286_v7 = vld [vmem:[#allocation5 + $0x620] sm:$0xff] }
  0xce   :  { %566 = vmatmul.mubr.f32.vlgmr.msra.gmra.mrb[16].mxu1 %v2978_v40  ;;  %v310_v16 = vld [vmem:[#allocation5 + $0x6e0] sm:$0xff]  ;;  %v319_v17 = vld [vmem:[#allocation5 + $0x728] sm:$0xff] }
  0xcf   :  { %2126 = vmatpush1.bf16.msra.mxu1 %v2125_v25  ;;  %571 = vmatprep.mubr.f32.mxu1 %v2980_v46  ;;  %v2141_v25 = vpack.c.bf16 %v166_v12, %v158_v11  ;;  %v222_v11 = vld [vmem:[#allocation5 + $0x420] sm:$0xff] }
  0xd0   :  { %2128 = vmatprep.subr.bf16.mxu1 %v2127_v29  ;;  %v2143_v29 = vpack.c.bf16 %v183_v19, %v175_v15  ;;  %2290 = vmatpush1.bf16.msra.mxu0 %v2289_v24  ;;  %v230_v12 = vld [vmem:[#allocation5 + $0x460] sm:$0xff]  ;;  %v239_v15 = vld [vmem:[#allocation5 + $0x4a8] sm:$0xff]  ;;  %v2305_v24 = vpack.c.bf16 %v1214_v23, %v1212_v21 }
  0xd1   :  { %2292 = vmatprep.subr.bf16.mxu0 %v2291_v36  ;;  %v247_v19 = vld [vmem:[#allocation5 + $0x4e8] sm:$0xff]  ;;  %v2307_v36 = vpack.c.bf16 %v1219_v33, %v1217_v32  ;;  %v318_v23 = vld [vmem:[#allocation5 + $0x720] sm:$0xff]  ;;  %v97_v33 = vld [vmem:[#allocation5 + $0x38] sm:$0xff] }
  0xd2   :  { %572 = vmatmul.mubr.f32.gmra.mrb[18].mxu1 %v2984_v50  ;;  %v342_v32 = vld [vmem:[#allocation5 + $0x7e0] sm:$0xff] }
  0xd3   :  { %2130 = vmatpush1.bf16.msra.mxu1 %v2129_v42  ;;  %577 = vmatprep.mubr.f32.mxu1 %v2986_v54  ;;  %v2145_v42 = vpack.c.bf16 %v182_v28, %v174_v27  ;;  %v238_v27 = vld [vmem:[#allocation5 + $0x4a0] sm:$0xff] }
  0xd4   :  { %2132 = vmatprep.subr.bf16.mxu1 %v2131_v45  ;;  %v2147_v45 = vpack.c.bf16 %v199_v35, %v191_v31  ;;  %2294 = vmatpush1.bf16.msra.mxu0 %v2293_v39  ;;  %v246_v28 = vld [vmem:[#allocation5 + $0x4e0] sm:$0xff]  ;;  %v255_v31 = vld [vmem:[#allocation5 + $0x528] sm:$0xff]  ;;  %v2309_v39 = vpack.c.bf16 %v1218_v38, %v1216_v37  ;;  %v96_v38 = vld [vmem:[#allocation5 + $0x30] sm:$0xff] }
  0xd5   :  { %2296 = vmatprep.subr.bf16.mxu0 %v2295_v52  ;;  %v263_v35 = vld [vmem:[#allocation5 + $0x568] sm:$0xff] }
  0xd6   :  { %578 = vmatmul.mubr.f32.gmra.mrb[20].mxu1 %v2990_v58  ;;  %v1220_v52 = vld [vmem:[#allocation8 + $0x1e0] sm:$0xff] }
  0xd7   :  { %2134 = vmatpush1.bf16.msra.mxu1 %v2133_v57  ;;  %583 = vmatprep.mubr.f32.mxu1 %v2992_v62  ;;  %v2149_v57 = vpack.c.bf16 %v198_v44, %v190_v43  ;;  %v254_v43 = vld [vmem:[#allocation5 + $0x520] sm:$0xff]  ;;  %v2313_v55 = vpack.c.bf16 %v1222_v53, %v1220_v52  ;;  %v128_v53 = vld [vmem:[#allocation5 + $0x130] sm:$0xff] }
  0xd8   :  { %2136 = vmatprep.subr.bf16.mxu1 %v2135_v61  ;;  %v2151_v61 = vpack.c.bf16 %v215_v51, %v207_v47  ;;  %2298 = vmatpush1.bf16.msra.mxu0 %v2297_v56  ;;  %v262_v44 = vld [vmem:[#allocation5 + $0x560] sm:$0xff]  ;;  %v1221_v47 = vld [vmem:[#allocation8 + $0x1e8] sm:$0xff] }
  0xd9   :  { %2300 = vmatprep.subr.bf16.mxu0 %v2299_v4  ;;  %v2311_v51 = vpack.c.bf16 %v1223_v48, %v1221_v47  ;;  %v2165_v56 = vpack.c.bf16 %v262_v44, %v254_v43  ;;  %v121_v43 = vld [vmem:[#allocation5 + $0xf8] sm:$0xff]  ;;  %v120_v47 = vld [vmem:[#allocation5 + $0xf0] sm:$0xff] }
  0xda   :  { %584 = vmatmul.mubr.f32.gmra.mrb[22].mxu1 %v2996_v2  ;;  %v129_v48 = vld [vmem:[#allocation5 + $0x138] sm:$0xff] }
  0xdb   :  { %2138 = vmatpush1.bf16.msra.mxu1 %v2137_v9  ;;  %589 = vmatprep.mubr.f32.mxu1 %v2998_v6  ;;  %v2153_v9 = vpack.c.bf16 %v214_v60, %v206_v59  ;;  %v278_v60 = vld [vmem:[#allocation5 + $0x5e0] sm:$0xff] }
  0xdc   :  { %2140 = vmatprep.subr.bf16.mxu1 %v2139_v13  ;;  %v2155_v13 = vpack.c.bf16 %v231_v3, %v223_v63  ;;  %2302 = vmatpush1.bf16.msra.mxu0 %v2301_v8  ;;  %v1227_v63 = vld [vmem:[#allocation8 + $0x218] sm:$0xff] }
  0xdd   :  { %2304 = vmatprep.subr.bf16.mxu0 %v2303_v20  ;;  %v294_v8 = vld [vmem:[#allocation5 + $0x660] sm:$0xff] }
  0xde   :  { %590 = vmatmul.mubr.f32.gmra.mrb[24].mxu1 %v3002_v10 }
  0xdf   :  { %2142 = vmatpush1.bf16.msra.mxu1 %v2141_v25  ;;  %595 = vmatprep.mubr.f32.mxu1 %v3004_v14  ;;  %v2157_v25 = vpack.c.bf16 %v230_v12, %v222_v11  ;;  %v311_v11 = vld [vmem:[#allocation5 + $0x6e8] sm:$0xff]  ;;  %v2173_v12 = vpack.c.bf16 %v294_v8, %v286_v7  ;;  %v176_v8 = vld [vmem:[#allocation5 + $0x2b0] sm:$0xff] }
  0xe0   :  { %2144 = vmatprep.subr.bf16.mxu1 %v2143_v29  ;;  %v2159_v29 = vpack.c.bf16 %v247_v19, %v239_v15  ;;  %2306 = vmatpush1.bf16.msra.mxu0 %v2305_v24  ;;  %v302_v15 = vld [vmem:[#allocation5 + $0x6a0] sm:$0xff]  ;;  %v327_v19 = vld [vmem:[#allocation5 + $0x768] sm:$0xff] }
  0xe1   :  { %2308 = vmatprep.subr.bf16.mxu0 %v2307_v36  ;;  %v2177_v20 = vpack.c.bf16 %v310_v16, %v302_v15  ;;  %v2179_v21 = vpack.c.bf16 %v327_v19, %v319_v17  ;;  %v326_v24 = vld [vmem:[#allocation5 + $0x760] sm:$0xff]  ;;  %v209_v15 = vld [vmem:[#allocation5 + $0x3b8] sm:$0xff]  ;;  %v208_v19 = vld [vmem:[#allocation5 + $0x3b0] sm:$0xff] }
  0xe2   :  { %596 = vmatmul.mubr.f32.gmra.mrb[26].mxu1 %v3008_v18  ;;  %v217_v16 = vld [vmem:[#allocation5 + $0x3f8] sm:$0xff] }
  0xe3   :  { %2146 = vmatpush1.bf16.msra.mxu1 %v2145_v42  ;;  %601 = vmatprep.mubr.f32.mxu1 %v3010_v22  ;;  %v2161_v42 = vpack.c.bf16 %v246_v28, %v238_v27  ;;  %v343_v27 = vld [vmem:[#allocation5 + $0x7e8] sm:$0xff]  ;;  %v2181_v28 = vpack.c.bf16 %v326_v24, %v318_v23  ;;  %v2215_v17 = vpack.c.bf16 %v217_v16, %v209_v15  ;;  %v224_v24 = vld [vmem:[#allocation5 + $0x430] sm:$0xff] }
  0xe4   :  { %2148 = vmatprep.subr.bf16.mxu1 %v2147_v45  ;;  %v2163_v45 = vpack.c.bf16 %v263_v35, %v255_v31  ;;  %2310 = vmatpush1.bf16.msra.mxu0 %v2309_v39  ;;  %v334_v31 = vld [vmem:[#allocation5 + $0x7a0] sm:$0xff]  ;;  %v105_v35 = vld [vmem:[#allocation5 + $0x78] sm:$0xff]  ;;  %v104_v39 = vld [vmem:[#allocation5 + $0x70] sm:$0xff] }
  0xe5   :  { %2312 = vmatprep.subr.bf16.mxu0 %v2311_v51  ;;  %v2185_v36 = vpack.c.bf16 %v342_v32, %v334_v31  ;;  %v2187_v37 = vpack.c.bf16 %v105_v35, %v97_v33  ;;  %v2189_v44 = vpack.c.bf16 %v104_v39, %v96_v38  ;;  %v240_v31 = vld [vmem:[#allocation5 + $0x4b0] sm:$0xff]  ;;  %v257_v32 = vld [vmem:[#allocation5 + $0x538] sm:$0xff] }
  0xe6   :  { %602 = vmatmul.mubr.f32.gmra.mrb[28].mxu1 %v3014_v26  ;;  %v265_v33 = vld [vmem:[#allocation5 + $0x578] sm:$0xff]  ;;  %v2747_v15 = vld [vmem:[#allocation2 + $0x30] sm:$0xff] }
  0xe7   :  { %2150 = vmatpush1.bf16.msra.mxu1 %v2149_v57  ;;  %607 = vmatprep.mubr.f32.mxu1 %v3016_v30  ;;  %v270_v57 = vld [vmem:[#allocation5 + $0x5a0] sm:$0xff]  ;;  %v2227_v35 = vpack.c.bf16 %v265_v33, %v257_v32  ;;  %v273_v38 = vld [vmem:[#allocation5 + $0x5b8] sm:$0xff] }
  0xe8   :  { %2152 = vmatprep.subr.bf16.mxu1 %v2151_v61  ;;  %v1225_v61 = vld [vmem:[#allocation8 + $0x208] sm:$0xff]  ;;  %2314 = vmatpush1.bf16.msra.mxu0 %v2313_v55  ;;  %v2169_v4 = vpack.c.bf16 %v278_v60, %v270_v57  ;;  %v153_v57 = vld [vmem:[#allocation5 + $0x1f8] sm:$0xff] }
  0xe9   :  { %v2315_v3 = vpack.c.bf16 %v1227_v63, %v1225_v61  ;;  %v136_v55 = vld [vmem:[#allocation5 + $0x170] sm:$0xff]  ;;  %v161_v63 = vld [vmem:[#allocation5 + $0x238] sm:$0xff] }
  0xea   :  { %608 = vmatmul.mubr.f32.gmra.mrb[30].mxu1 %v3020_v34  ;;  %v144_v61 = vld [vmem:[#allocation5 + $0x1b0] sm:$0xff]  ;;  %v2203_v1 = vpack.c.bf16 %v169_v0, %v161_v63  ;;  %v281_v39 = vld [vmem:[#allocation5 + $0x5f8] sm:$0xff] }
  0xeb   :  { %2154 = vmatpush1.bf16.msra.mxu1 %v2153_v9  ;;  %678 = vmatprep.mubr.f32.mxu1 %v2975_v41  ;;  %v271_v41 = vld [vmem:[#allocation5 + $0x5a8] sm:$0xff]  ;;  %v320_v0 = vld [vmem:[#allocation5 + $0x730] sm:$0xff] }
  0xec   :  { %2156 = vmatprep.subr.bf16.mxu1 %v2155_v13  ;;  %v2167_v59 = vpack.c.bf16 %v279_v49, %v271_v41  ;;  %2316 = vmatprep.subr.bf16.mxu0 %v2315_v3  ;;  %v303_v9 = vld [vmem:[#allocation5 + $0x6a8] sm:$0xff]  ;;  %v112_v41 = vld [vmem:[#allocation5 + $0xb0] sm:$0xff]  ;;  %v137_v49 = vld [vmem:[#allocation5 + $0x178] sm:$0xff] }
  0xed   :  { %v2175_v13 = vpack.c.bf16 %v311_v11, %v303_v9  ;;  %v2193_v51 = vpack.c.bf16 %v120_v47, %v112_v41  ;;  %v2195_v52 = vpack.c.bf16 %v137_v49, %v129_v48  ;;  %v160_v3 = vld [vmem:[#allocation5 + $0x230] sm:$0xff]  ;;  %v193_v9 = vld [vmem:[#allocation5 + $0x338] sm:$0xff] }
  0xee   :  { %v201_v11 = vld [vmem:[#allocation5 + $0x378] sm:$0xff]  ;;  %v288_v49 = vld [vmem:[#allocation5 + $0x630] sm:$0xff] }
  0xef   :  { %2158 = vmatpush1.bf16.msra.mxu1 %v2157_v25  ;;  %v335_v25 = vld [vmem:[#allocation5 + $0x7a8] sm:$0xff]  ;;  %v297_v41 = vld [vmem:[#allocation5 + $0x678] sm:$0xff] }
  0xf0   :  { %2160 = vmatprep.subr.bf16.mxu1 %v2159_v29  ;;  %v2183_v29 = vpack.c.bf16 %v343_v27, %v335_v25  ;;  %v241_v25 = vld [vmem:[#allocation5 + $0x4b8] sm:$0xff] }
  0xf1   :  { %v249_v27 = vld [vmem:[#allocation5 + $0x4f8] sm:$0xff] }
  0xf3   :  { %2162 = vmatpush1.bf16.msra.mxu1 %v2161_v42  ;;  %v113_v42 = vld [vmem:[#allocation5 + $0xb8] sm:$0xff] }
  0xf4   :  { %2164 = vmatprep.subr.bf16.mxu1 %v2163_v45  ;;  %v2191_v45 = vpack.c.bf16 %v121_v43, %v113_v42  ;;  %v2231_v42 = vpack.c.bf16 %v281_v39, %v273_v38  ;;  %v272_v43 = vld [vmem:[#allocation5 + $0x5b0] sm:$0xff] }
  0xf5   :  { %v2755_v39 = vld [vmem:[#allocation2 + $0x70] sm:$0xff] }
  0xf7   :  { %2166 = vmatpush1.bf16.msra.mxu1 %v2165_v56  ;;  %v145_v56 = vld [vmem:[#allocation5 + $0x1b8] sm:$0xff] }
  0xf8   :  { %2168 = vmatprep.subr.bf16.mxu1 %v2167_v59  ;;  %v2197_v59 = vpack.c.bf16 %v136_v55, %v128_v53  ;;  %v2199_v60 = vpack.c.bf16 %v153_v57, %v145_v56  ;;  %v313_v53 = vld [vmem:[#allocation5 + $0x6f8] sm:$0xff]  ;;  %v304_v57 = vld [vmem:[#allocation5 + $0x6b0] sm:$0xff] }
  0xfb   :  { %2170 = vmatpush1.bf16.msra.mxu1 %v2169_v4  ;;  %v177_v4 = vld [vmem:[#allocation5 + $0x2b8] sm:$0xff] }
  0xfc   :  { %2172 = vmatprep.subr.bf16.mxu1 %v2171_v5  ;;  %v185_v5 = vld [vmem:[#allocation5 + $0x2f8] sm:$0xff] }
  0xfd   :  { %v2207_v7 = vpack.c.bf16 %v185_v5, %v177_v4  ;;  %v336_v5 = vld [vmem:[#allocation5 + $0x7b0] sm:$0xff] }
  0xff   :  { %2174 = vmatpush1.bf16.msra.mxu1 %v2173_v12  ;;  %v2211_v12 = vpack.c.bf16 %v201_v11, %v193_v9  ;;  %v2743_v9 = vld [vmem:[#allocation2 + $0x10] sm:$0xff]  ;;  %v348_v11 = vlaneseq }
 0x100   :  { %2176 = vmatprep.subr.bf16.mxu1 %v2175_v13  ;;  %v192_v13 = vld [vmem:[#allocation5 + $0x330] sm:$0xff] }
 0x103   :  { %2178 = vmatpush1.bf16.msra.mxu1 %v2177_v20  ;;  %v225_v20 = vld [vmem:[#allocation5 + $0x438] sm:$0xff] }
 0x104   :  { %2180 = vmatprep.subr.bf16.mxu1 %v2179_v21  ;;  %v233_v21 = vld [vmem:[#allocation5 + $0x478] sm:$0xff] }
 0x105   :  { %v2219_v23 = vpack.c.bf16 %v233_v21, %v225_v20  ;;  %v2750_v21 = vld [vmem:[#allocation2 + $0x58] sm:$0xff] }
 0x107   :  { %2182 = vmatpush1.bf16.msra.mxu1 %v2181_v28  ;;  %v2740_v28 = vld [vmem:[#allocation2 + $0x8] sm:$0xff] }
 0x108   :  { %2184 = vmatprep.subr.bf16.mxu1 %v2183_v29  ;;  %v2223_v29 = vpack.c.bf16 %v249_v27, %v241_v25  ;;  %v2751_v25 = vld [vmem:[#allocation2 + $0x50] sm:$0xff] }
 0x10b   :  { %2186 = vmatpush1.bf16.msra.mxu1 %v2185_v36  ;;  %v256_v36 = vld [vmem:[#allocation5 + $0x530] sm:$0xff] }
 0x10c   :  { %2188 = vmatprep.subr.bf16.mxu1 %v2187_v37  ;;  %v264_v37 = vld [vmem:[#allocation5 + $0x570] sm:$0xff] }
 0x10e   :  { %679 = vmatmul.mubr.f32.vlgmr.msra.gmra.mrb[32].mxu1 %v2978_v40  ;;  %v152_v40 = vld [vmem:[#allocation5 + $0x1f0] sm:$0xff] }
 0x10f   :  { %2190 = vmatpush1.bf16.msra.mxu1 %v2189_v44  ;;  %684 = vmatprep.mubr.f32.mxu1 %v2980_v46  ;;  %v2201_v46 = vpack.c.bf16 %v152_v40, %v144_v61  ;;  %v280_v44 = vld [vmem:[#allocation5 + $0x5f0] sm:$0xff]  ;;  %v329_v61 = vld [vmem:[#allocation5 + $0x778] sm:$0xff] }
 0x110   :  { %2192 = vmatprep.subr.bf16.mxu1 %v2191_v45  ;;  %v289_v45 = vld [vmem:[#allocation5 + $0x638] sm:$0xff]  ;;  %v2233_v47 = vpack.c.bf16 %v280_v44, %v272_v43 }
 0x111   :  { %v2235_v48 = vpack.c.bf16 %v297_v41, %v289_v45 }
 0x112   :  { %685 = vmatmul.mubr.f32.gmra.mrb[34].mxu1 %v2984_v50  ;;  %v168_v50 = vld [vmem:[#allocation5 + $0x270] sm:$0xff] }
 0x113   :  { %2194 = vmatpush1.bf16.msra.mxu1 %v2193_v51  ;;  %690 = vmatprep.mubr.f32.mxu1 %v2986_v54  ;;  %v2205_v54 = vpack.c.bf16 %v168_v50, %v160_v3  ;;  %v296_v51 = vld [vmem:[#allocation5 + $0x670] sm:$0xff]  ;;  %v345_v3 = vld [vmem:[#allocation5 + $0x7f8] sm:$0xff] }
 0x114   :  { %2196 = vmatprep.subr.bf16.mxu1 %v2195_v52  ;;  %v305_v52 = vld [vmem:[#allocation5 + $0x6b8] sm:$0xff]  ;;  %v2237_v55 = vpack.c.bf16 %v296_v51, %v288_v49 }
 0x115   :  { %v2239_v56 = vpack.c.bf16 %v313_v53, %v305_v52 }
 0x116   :  { %691 = vmatmul.mubr.f32.gmra.mrb[36].mxu1 %v2990_v58  ;;  %v184_v58 = vld [vmem:[#allocation5 + $0x2f0] sm:$0xff] }
 0x117   :  { %2198 = vmatpush1.bf16.msra.mxu1 %v2197_v59  ;;  %696 = vmatprep.mubr.f32.mxu1 %v2992_v62  ;;  %v2209_v62 = vpack.c.bf16 %v184_v58, %v176_v8  ;;  %v312_v59 = vld [vmem:[#allocation5 + $0x6f0] sm:$0xff]  ;;  %v2741_v8 = vld [vmem:[#allocation2] sm:$0xff]  ;;  %v2742_v58 = vld [vmem:[#allocation2 + $0x18] sm:$0xff] }
 0x118   :  { %2200 = vmatprep.subr.bf16.mxu1 %v2199_v60  ;;  %v321_v60 = vld [vmem:[#allocation5 + $0x738] sm:$0xff]  ;;  %v2241_v40 = vpack.c.bf16 %v312_v59, %v304_v57 }
 0x119   :  { %v2243_v63 = vpack.c.bf16 %v329_v61, %v321_v60  ;;  %v1226_v57 = vld [vmem:[#allocation8 + $0x210] sm:$0xff] }
 0x11a   :  { %697 = vmatmul.mubr.f32.gmra.mrb[38].mxu1 %v2996_v2  ;;  %v200_v2 = vld [vmem:[#allocation5 + $0x370] sm:$0xff] }
 0x11b   :  { %2202 = vmatpush1.bf16.msra.mxu1 %v2201_v46  ;;  %702 = vmatprep.mubr.f32.mxu1 %v2998_v6  ;;  %v2213_v6 = vpack.c.bf16 %v200_v2, %v192_v13  ;;  %v328_v46 = vld [vmem:[#allocation5 + $0x770] sm:$0xff]  ;;  %v3055_v13 = vshrl.u32 %v348_v11, 7  ;;  %v2746_v2 = vld [vmem:[#allocation2 + $0x38] sm:$0xff] }
 0x11c   :  { %2204 = vmatprep.subr.bf16.mxu1 %v2203_v1  ;;  %v337_v1 = vld [vmem:[#allocation5 + $0x7b8] sm:$0xff]  ;;  %v2245_v50 = vpack.c.bf16 %v328_v46, %v320_v0  ;;  %v1231_v0 = vld [vmem:[#allocation8 + $0x238] sm:$0xff] }
 0x11d   :  { %v2247_v4 = vpack.c.bf16 %v345_v3, %v337_v1  ;;  %v350_v16 = vsub.s32 0, %v3055_v13 }
 0x11e   :  { %703 = vmatmul.mubr.f32.gmra.mrb[40].mxu1 %v3002_v10  ;;  %v216_v10 = vld [vmem:[#allocation5 + $0x3f0] sm:$0xff] }
 0x11f   :  { %2206 = vmatpush1.bf16.msra.mxu1 %v2205_v54  ;;  %708 = vmatprep.mubr.f32.mxu1 %v3004_v14  ;;  %v2217_v14 = vpack.c.bf16 %v216_v10, %v208_v19  ;;  %v344_v54 = vld [vmem:[#allocation5 + $0x7f0] sm:$0xff]  ;;  %v354_v19 = vsub.s32 1, %v3055_v13  ;;  %v2749_v10 = vld [vmem:[#allocation2 + $0x40] sm:$0xff] }
 0x120   :  { %2208 = vmatprep.subr.bf16.mxu1 %v2207_v7  ;;  %v2249_v7 = vpack.c.bf16 %v344_v54, %v336_v5 }
 0x122   :  { %709 = vmatmul.mubr.f32.gmra.mrb[42].mxu1 %v3008_v18  ;;  %v232_v18 = vld [vmem:[#allocation5 + $0x470] sm:$0xff] }
 0x123   :  { %2210 = vmatpush1.bf16.msra.mxu1 %v2209_v62  ;;  %714 = vmatprep.mubr.f32.mxu1 %v3010_v22  ;;  %v2221_v22 = vpack.c.bf16 %v232_v18, %v224_v24  ;;  %v2744_v62 = vld [vmem:[#allocation2 + $0x28] sm:$0xff] }
 0x124   :  { %2212 = vmatprep.subr.bf16.mxu1 %v2211_v12  ;;  %v2745_v12 = vld [vmem:[#allocation2 + $0x20] sm:$0xff] }
 0x126   :  { %715 = vmatmul.mubr.f32.gmra.mrb[44].mxu1 %v3014_v26  ;;  %v248_v26 = vld [vmem:[#allocation5 + $0x4f0] sm:$0xff] }
 0x127   :  { %2214 = vmatpush1.bf16.msra.mxu1 %v2213_v6  ;;  %720 = vmatprep.mubr.f32.mxu1 %v3016_v30  ;;  %v2225_v30 = vpack.c.bf16 %v248_v26, %v240_v31  ;;  %v2748_v6 = vld [vmem:[#allocation2 + $0x48] sm:$0xff]  ;;  %v2753_v26 = vld [vmem:[#allocation2 + $0x60] sm:$0xff] }
 0x128   :  { %2216 = vmatprep.subr.bf16.mxu1 %v2215_v17  ;;  %v3058_v17 = vld [vmem:[#allocation7] sm:$0xff] }
 0x129   :  { %v3064_v20 = vrot.slane %v3058_v17, %v350_v16 }
 0x12a   :  { %721 = vmatmul.mubr.f32.gmra.mrb[46].mxu1 %v3020_v34  ;;  %v2229_v34 = vpack.c.bf16 %v264_v37, %v256_v36 }
 0x12b   :  { %2218 = vmatpush1.bf16.msra.mxu1 %v2217_v14  ;;  %791 = vmatprep.mubr.f32.mxu1 %v2740_v28  ;;  %v3069_v14 = vrot.slane %v3058_v17, %v354_v19 }
 0x12c   :  { %2220 = vmatprep.subr.bf16.mxu1 %v2219_v23 }
 0x12f   :  { %2222 = vmatpush1.bf16.msra.mxu1 %v2221_v22  ;;  %v2752_v22 = vld [vmem:[#allocation2 + $0x68] sm:$0xff] }
 0x130   :  { %2224 = vmatprep.subr.bf16.mxu1 %v2223_v29 }
 0x133   :  { %2226 = vmatpush1.bf16.msra.mxu1 %v2225_v30  ;;  %v2754_v30 = vld [vmem:[#allocation2 + $0x78] sm:$0xff] }
 0x134   :  { %2228 = vmatprep.subr.bf16.mxu1 %v2227_v35 }
 0x137   :  { %2230 = vmatpush1.bf16.msra.mxu1 %v2229_v34 }
 0x138   :  { %2232 = vmatprep.subr.bf16.mxu1 %v2231_v42 }
 0x13b   :  { %2234 = vmatpush1.bf16.msra.mxu1 %v2233_v47 }
 0x13c   :  { %2236 = vmatprep.subr.bf16.mxu1 %v2235_v48 }
 0x13f   :  { %2238 = vmatpush1.bf16.msra.mxu1 %v2237_v55 }
 0x140   :  { %2240 = vmatprep.subr.bf16.mxu1 %v2239_v56  ;;  %v1224_v56 = vld [vmem:[#allocation8 + $0x200] sm:$0xff] }
 0x143   :  { %2242 = vmatpush1.bf16.msra.mxu1 %v2241_v40 }
 0x144   :  { %2244 = vmatprep.subr.bf16.mxu1 %v2243_v63  ;;  %v1229_v63 = vld [vmem:[#allocation8 + $0x228] sm:$0xff] }
 0x147   :  { %2246 = vmatpush1.bf16.msra.mxu1 %v2245_v50 }
 0x148   :  { %2248 = vmatprep.subr.bf16.mxu1 %v2247_v4 }
 0x14b   :  { %2250 = vmatpush1.bf16.msra.mxu1 %v2249_v7 }
 0x14e   :  { %792 = vmatmul.mubr.f32.vlgmr.msra.gmra.mrb[48].mxu1 %v2741_v8  ;;  %v2317_v8 = vpack.c.bf16 %v1226_v57, %v1224_v56 }
 0x14f   :  { %797 = vmatprep.mubr.f32.mxu1 %v2742_v58 }
 0x152   :  { %798 = vmatmul.mubr.f32.gmra.mrb[50].mxu1 %v2743_v9 }
 0x153   :  { %803 = vmatprep.mubr.f32.mxu1 %v2744_v62 }
 0x156   :  { %804 = vmatmul.mubr.f32.gmra.mrb[52].mxu1 %v2745_v12  ;;  %v2319_v12 = vpack.c.bf16 %v1231_v0, %v1229_v63  ;;  %v1236_v63 = vld [vmem:[#allocation8 + $0x260] sm:$0xff] }
 0x157   :  { %809 = vmatprep.mubr.f32.mxu1 %v2746_v2  ;;  %v1228_v2 = vld [vmem:[#allocation8 + $0x220] sm:$0xff] }
 0x15a   :  { %810 = vmatmul.mubr.f32.gmra.mrb[54].mxu1 %v2747_v15  ;;  %v1230_v15 = vld [vmem:[#allocation8 + $0x230] sm:$0xff] }
 0x15b   :  { %815 = vmatprep.mubr.f32.mxu1 %v2748_v6 }
 0x15e   :  { %816 = vmatmul.mubr.f32.gmra.mrb[56].mxu1 %v2749_v10 }
 0x15f   :  { %821 = vmatprep.mubr.f32.mxu1 %v2750_v21 }
 0x161   :  { %v454_v23 = vpop.f32.mrb[0].mxu1 }
 0x162   :  { %v455_v24 = vadd.f32 %v454_v23, %v3064_v20  ;;  %v456_v18 = vpop.f32.mrb[1].mxu1  ;;  %822 = vmatmul.mubr.f32.gmra.mrb[58].mxu1 %v2751_v25  ;;  %v1233_v23 = vld [vmem:[#allocation8 + $0x248] sm:$0xff] }
 0x163   :  { %v457_v27 = vadd.f32 %v456_v18, %v3069_v14  ;;  %827 = vmatprep.mubr.f32.mxu1 %v2752_v22 }
 0x164   :  { %v904_v28 = vmul.f32 0.70710677, %v455_v24  ;;  %v840_v3 = vmul.f32 0.5, %v455_v24  ;;  %v1235_v24 = vld [vmem:[#allocation8 + $0x258] sm:$0xff] }
 0x165   :  { %v905_v29 = vmul.f32 0.70710677, %v457_v27  ;;  %v460_v31 = vpop.f32.mrb[2].mxu1  ;;  %v841_v61 = vmul.f32 0.5, %v457_v27 }
 0x166   :  { %2580 = verf.f32 %v904_v28  ;;  %828 = vmatmul.mubr.f32.gmra.mrb[60].mxu1 %v2753_v26  ;;  %v461_v32 = vadd.f32 %v460_v31, %v3064_v20  ;;  %v462_v33 = vpop.f32.mrb[3].mxu1  ;;  %v2321_v26 = vpack.c.bf16 %v1230_v15, %v1228_v2 }
 0x167   :  { %2582 = verf.f32 %v905_v29  ;;  %833 = vmatprep.mubr.f32.mxu1 %v2754_v30  ;;  %v463_v35 = vadd.f32 %v462_v33, %v3069_v14 }
 0x168   :  { %v912_v36 = vmul.f32 0.70710677, %v461_v32  ;;  %v848_v50 = vmul.f32 0.5, %v461_v32 }
 0x169   :  { %v913_v37 = vmul.f32 0.70710677, %v463_v35  ;;  %v466_v38 = vpop.f32.mrb[4].mxu1  ;;  %v849_v7 = vmul.f32 0.5, %v463_v35 }
 0x16a   :  { %834 = vmatmul.mubr.f32.gmra.mrb[62].mxu1 %v2755_v39  ;;  %2584 = verf.f32 %v912_v36  ;;  %v467_v34 = vadd.f32 %v466_v38, %v3064_v20  ;;  %v468_v42 = vpop.f32.mrb[5].mxu1  ;;  %v2323_v36 = vpack.c.bf16 %v1235_v24, %v1233_v23  ;;  %v1234_v38 = vld [vmem:[#allocation8 + $0x250] sm:$0xff]  ;;  %v1245_v24 = vld [vmem:[#allocation8 + $0x2a8] sm:$0xff] }
 0x16b   :  { %2586 = verf.f32 %v913_v37  ;;  %v469_v43 = vadd.f32 %v468_v42, %v3069_v14  ;;  %v1232_v37 = vld [vmem:[#allocation8 + $0x240] sm:$0xff] }
 0x16c   :  { %v920_v44 = vmul.f32 0.70710677, %v467_v34  ;;  %v856_v27 = vmul.f32 0.5, %v467_v34  ;;  %v2325_v56 = vpack.c.bf16 %v1234_v38, %v1232_v37  ;;  %v1249_v37 = vld [vmem:[#allocation8 + $0x2c8] sm:$0xff]  ;;  %v1251_v38 = vld [vmem:[#allocation8 + $0x2d8] sm:$0xff] }
 0x16d   :  { %v921_v45 = vmul.f32 0.70710677, %v469_v43  ;;  %v472_v41 = vpop.f32.mrb[6].mxu1  ;;  %v857_v31 = vmul.f32 0.5, %v469_v43 }
 0x16e   :  { %2588 = verf.f32 %v920_v44  ;;  %v3078_v47 = vadd.f32 %v472_v41, %v3064_v20  ;;  %v474_v48 = vpop.f32.mrb[7].mxu1  ;;  %v1237_v44 = vld [vmem:[#allocation8 + $0x268] sm:$0xff] }
 0x16f   :  { %2590 = verf.f32 %v921_v45  ;;  %v3081_v49 = vadd.f32 %v474_v48, %v3069_v14  ;;  %v1239_v45 = vld [vmem:[#allocation8 + $0x278] sm:$0xff] }
 0x170   :  { %v2581_v51 = vpop.eup %2580  ;;  %v928_v52 = vmul.f32 0.70710677, %v3078_v47  ;;  %v864_v48 = vmul.f32 0.5, %v3078_v47  ;;  %v1238_v47 = vld [vmem:[#allocation8 + $0x270] sm:$0xff] }
 0x171   :  { %v2583_v53 = vpop.eup %2582  ;;  %v1032_v55 = vadd.f32 1.0, %v2581_v51  ;;  %v929_v59 = vmul.f32 0.70710677, %v3081_v49  ;;  %v478_v60 = vpop.f32.mrb[8].mxu1 }
 0x172   :  { %v1033_v40 = vadd.f32 1.0, %v2583_v53  ;;  %2592 = verf.f32 %v928_v52  ;;  %v3086_v46 = vadd.f32 %v478_v60, %v3064_v20  ;;  %v480_v1 = vpop.f32.mrb[9].mxu1 }
 0x173   :  { %2594 = verf.f32 %v929_v59  ;;  %v3089_v4 = vadd.f32 %v480_v1, %v3069_v14  ;;  %v1096_v62 = vmul.f32 %v1032_v55, %v840_v3  ;;  %v865_v55 = vmul.f32 0.5, %v3081_v49 }
 0x174   :  { %v2585_v5 = vpop.eup %2584  ;;  %v1097_v54 = vmul.f32 %v1033_v40, %v841_v61  ;;  %v936_v58 = vmul.f32 0.70710677, %v3086_v46  ;;  %v2327_v40 = vpack.c.bf16 %v1239_v45, %v1237_v44 }
 0x175   :  { %v2587_v9 = vpop.eup %2586  ;;  %v1040_v11 = vadd.f32 1.0, %v2585_v5  ;;  %v937_v6 = vmul.f32 0.70710677, %v3089_v4  ;;  %v484_v10 = vpop.f32.mrb[10].mxu1  ;;  %v1243_v5 = vld [vmem:[#allocation8 + $0x298] sm:$0xff] }
 0x176   :  { %1492 = vmatprep.mubr.f32.mxu0 %v1097_v54  ;;  %v1041_v21 = vadd.f32 1.0, %v2587_v9  ;;  %2596 = verf.f32 %v936_v58  ;;  %v3094_v18 = vadd.f32 %v484_v10, %v3064_v20  ;;  %v486_v25 = vpop.f32.mrb[11].mxu1  ;;  %v1240_v10 = vld [vmem:[#allocation8 + $0x280] sm:$0xff] }
 0x177   :  { %1493 = vmatmul.mubr.f32.vlgmr.msra.gmra.mrb[0].mxu0 %v1096_v62  ;;  %2598 = verf.f32 %v937_v6  ;;  %v3097_v22 = vadd.f32 %v486_v25, %v3069_v14  ;;  %v1104_v28 = vmul.f32 %v1040_v11, %v848_v50  ;;  %v1241_v50 = vld [vmem:[#allocation8 + $0x288] sm:$0xff]  ;;  %v873_v11 = vmul.f32 0.5, %v3089_v4  ;;  %v1247_v25 = vld [vmem:[#allocation8 + $0x2b8] sm:$0xff] }
 0x178   :  { %v2589_v29 = vpop.eup %2588  ;;  %2318 = vmatpush1.bf16.msra.mxu0 %v2317_v8  ;;  %v944_v32 = vmul.f32 0.70710677, %v3094_v18  ;;  %v1105_v33 = vmul.f32 %v1041_v21, %v849_v7  ;;  %v872_v7 = vmul.f32 0.5, %v3086_v46  ;;  %v2329_v62 = vpack.c.bf16 %v1238_v47, %v1236_v63  ;;  %v1242_v21 = vld [vmem:[#allocation8 + $0x290] sm:$0xff] }
 0x179   :  { %v2591_v30 = vpop.eup %2590  ;;  %v1048_v35 = vadd.f32 1.0, %v2589_v29  ;;  %2320 = vmatprep.subr.bf16.mxu0 %v2319_v12  ;;  %v945_v39 = vmul.f32 0.70710677, %v3097_v22  ;;  %v490_v34 = vpop.f32.mrb[12].mxu1  ;;  %v2333_v29 = vpack.c.bf16 %v1242_v21, %v1240_v10  ;;  %v1265_v10 = vld [vmem:[#allocation8 + $0x348] sm:$0xff]  ;;  %v1267_v21 = vld [vmem:[#allocation8 + $0x358] sm:$0xff] }
 0x17a   :  { %v1049_v42 = vadd.f32 1.0, %v2591_v30  ;;  %2600 = verf.f32 %v944_v32  ;;  %v3102_v41 = vadd.f32 %v490_v34, %v3064_v20  ;;  %v492_v43 = vpop.f32.mrb[13].mxu1  ;;  %1498 = vmatprep.mubr.f32.mxu0 %v1105_v33  ;;  %v2335_v33 = vpack.c.bf16 %v1247_v25, %v1245_v24  ;;  %v1244_v30 = vld [vmem:[#allocation8 + $0x2a0] sm:$0xff]  ;;  %v1266_v25 = vld [vmem:[#allocation8 + $0x350] sm:$0xff] }
 0x17b   :  { %2602 = verf.f32 %v945_v39  ;;  %v3106_v51 = vadd.f32 %v492_v43, %v3069_v14  ;;  %1499 = vmatmul.mubr.f32.gmra.mrb[2].mxu0 %v1104_v28  ;;  %v1112_v52 = vmul.f32 %v1048_v35, %v856_v27  ;;  %v881_v28 = vmul.f32 0.5, %v3097_v22  ;;  %v1246_v35 = vld [vmem:[#allocation8 + $0x2b0] sm:$0xff]  ;;  %v1264_v24 = vld [vmem:[#allocation8 + $0x340] sm:$0xff] }
 0x17c   :  { %v2593_v53 = vpop.eup %2592  ;;  %2322 = vmatpush1.bf16.msra.mxu0 %v2321_v26  ;;  %v952_v57 = vmul.f32 0.70710677, %v3102_v41  ;;  %v1113_v59 = vmul.f32 %v1049_v42, %v857_v31  ;;  %v2337_v42 = vpack.c.bf16 %v1246_v35, %v1244_v30  ;;  %v1273_v30 = vld [vmem:[#allocation8 + $0x388] sm:$0xff]  ;;  %v1275_v35 = vld [vmem:[#allocation8 + $0x398] sm:$0xff] }
 0x17d   :  { %v2595_v60 = vpop.eup %2594  ;;  %v1056_v61 = vadd.f32 1.0, %v2593_v53  ;;  %2324 = vmatprep.subr.bf16.mxu0 %v2323_v36  ;;  %v953_v0 = vmul.f32 0.70710677, %v3106_v51  ;;  %v496_v1 = vpop.f32.mrb[14].mxu1  ;;  %v889_v22 = vmul.f32 0.5, %v3106_v51  ;;  %v1250_v53 = vld [vmem:[#allocation8 + $0x2d0] sm:$0xff] }
 0x17e   :  { %v1057_v3 = vadd.f32 1.0, %v2595_v60  ;;  %2604 = verf.f32 %v952_v57  ;;  %v497_v54 = vadd.f32 %v496_v1, %v3064_v20  ;;  %v498_v49 = vpop.f32.mrb[15].mxu1  ;;  %1504 = vmatprep.mubr.f32.mxu0 %v1113_v59  ;;  %v2331_v20 = vpack.c.bf16 %v1243_v5, %v1241_v50  ;;  %v1255_v57 = vld [vmem:[#allocation8 + $0x2f8] sm:$0xff]  ;;  %v1252_v1 = vld [vmem:[#allocation8 + $0x2e0] sm:$0xff]  ;;  %v1257_v5 = vld [vmem:[#allocation8 + $0x308] sm:$0xff] }
 0x17f   :  { %2606 = verf.f32 %v953_v0  ;;  %v499_v8 = vadd.f32 %v498_v49, %v3069_v14  ;;  %1505 = vmatmul.mubr.f32.gmra.mrb[4].mxu0 %v1112_v52  ;;  %v1120_v58 = vmul.f32 %v1056_v61, %v864_v48  ;;  %v880_v14 = vmul.f32 0.5, %v3094_v18  ;;  %v1248_v52 = vld [vmem:[#allocation8 + $0x2c0] sm:$0xff]  ;;  %v1259_v49 = vld [vmem:[#allocation8 + $0x318] sm:$0xff] }
 0x180   :  { %v2597_v9 = vpop.eup %2596  ;;  %2326 = vmatpush1.bf16.msra.mxu0 %v2325_v56  ;;  %v960_v12 = vmul.f32 0.70710677, %v497_v54  ;;  %v1121_v2 = vmul.f32 %v1057_v3, %v865_v55  ;;  %v888_v18 = vmul.f32 0.5, %v3102_v41  ;;  %v2339_v48 = vpack.c.bf16 %v1251_v38, %v1249_v37  ;;  %v1253_v56 = vld [vmem:[#allocation8 + $0x2e8] sm:$0xff]  ;;  %v1254_v3 = vld [vmem:[#allocation8 + $0x2f0] sm:$0xff] }
 0x181   :  { %v2599_v15 = vpop.eup %2598  ;;  %v1064_v6 = vadd.f32 1.0, %v2597_v9  ;;  %2328 = vmatprep.subr.bf16.mxu0 %v2327_v40  ;;  %v961_v23 = vmul.f32 0.70710677, %v499_v8  ;;  %v896_v59 = vmul.f32 0.5, %v497_v54  ;;  %v897_v61 = vmul.f32 0.5, %v499_v8  ;;  %v1256_v8 = vld [vmem:[#allocation8 + $0x300] sm:$0xff] }
 0x182   :  { %v1065_v46 = vadd.f32 1.0, %v2599_v15  ;;  %2608 = verf.f32 %v960_v12  ;;  %1510 = vmatprep.mubr.f32.mxu0 %v1121_v2  ;;  %v2341_v40 = vpack.c.bf16 %v1250_v53, %v1248_v52  ;;  %v2343_v0 = vpack.c.bf16 %v1255_v57, %v1253_v56  ;;  %v1263_v12 = vld [vmem:[#allocation8 + $0x338] sm:$0xff]  ;;  %v1278_v56 = vld [vmem:[#allocation8 + $0x3b0] sm:$0xff] }
 0x183   :  { %2610 = verf.f32 %v961_v23  ;;  %1511 = vmatmul.mubr.f32.gmra.mrb[6].mxu0 %v1120_v58  ;;  %v1128_v4 = vmul.f32 %v1064_v6, %v872_v7  ;;  %v2345_v54 = vpack.c.bf16 %v1254_v3, %v1252_v1  ;;  %v2347_v9 = vpack.c.bf16 %v1259_v49, %v1257_v5  ;;  %v1260_v6 = vld [vmem:[#allocation8 + $0x320] sm:$0xff]  ;;  %v1282_v1 = vld [vmem:[#allocation8 + $0x3d0] sm:$0xff]  ;;  %v1285_v5 = vld [vmem:[#allocation8 + $0x3e8] sm:$0xff] }
 0x184   :  { %v2601_v27 = vpop.eup %2600  ;;  %2330 = vmatpush1.bf16.msra.mxu0 %v2329_v62  ;;  %v1129_v31 = vmul.f32 %v1065_v46, %v873_v11  ;;  %v1258_v11 = vld [vmem:[#allocation8 + $0x310] sm:$0xff]  ;;  %v1261_v62 = vld [vmem:[#allocation8 + $0x328] sm:$0xff]  ;;  %v2355_v46 = vpack.c.bf16 %v1267_v21, %v1265_v10  ;;  %v1287_v49 = vld [vmem:[#allocation8 + $0x3f8] sm:$0xff] }
 0x185   :  { %v2603_v26 = vpop.eup %2602  ;;  %v1072_v32 = vadd.f32 1.0, %v2601_v27  ;;  %2332 = vmatprep.subr.bf16.mxu0 %v2331_v20  ;;  %v2349_v2 = vpack.c.bf16 %v1258_v11, %v1256_v8  ;;  %v2351_v15 = vpack.c.bf16 %v1263_v12, %v1261_v62  ;;  %v1262_v20 = vld [vmem:[#allocation8 + $0x330] sm:$0xff]  ;;  %v1271_v27 = vld [vmem:[#allocation8 + $0x378] sm:$0xff]  ;;  %v2375_v11 = vpack.c.bf16 %v1287_v49, %v1285_v5  ;;  %v1284_v62 = vld [vmem:[#allocation8 + $0x3e0] sm:$0xff] }
 0x186   :  { %v1073_v36 = vadd.f32 1.0, %v2603_v26  ;;  %1516 = vmatprep.mubr.f32.mxu0 %v1129_v31  ;;  %v2353_v23 = vpack.c.bf16 %v1262_v20, %v1260_v6  ;;  %v1268_v26 = vld [vmem:[#allocation8 + $0x360] sm:$0xff]  ;;  %v1286_v12 = vld [vmem:[#allocation8 + $0x3f0] sm:$0xff]  ;;  %v1289_v6 = vld [vmem:[#allocation8 + $0x408] sm:$0xff] }
 0x187   :  { %1517 = vmatmul.mubr.f32.gmra.mrb[8].mxu0 %v1128_v4  ;;  %v1136_v39 = vmul.f32 %v1072_v32, %v880_v14  ;;  %v358_v14 = vsub.s32 2, %v3055_v13  ;;  %v1269_v4 = vld [vmem:[#allocation8 + $0x368] sm:$0xff]  ;;  %v1270_v32 = vld [vmem:[#allocation8 + $0x370] sm:$0xff]  ;;  %v1291_v20 = vld [vmem:[#allocation8 + $0x418] sm:$0xff] }
 0x188   :  { %v2605_v34 = vpop.eup %2604  ;;  %2334 = vmatpush1.bf16.msra.mxu0 %v2333_v29  ;;  %v1137_v44 = vmul.f32 %v1073_v36, %v881_v28  ;;  %v362_v28 = vsub.s32 3, %v3055_v13  ;;  %v2357_v29 = vpack.c.bf16 %v1266_v25, %v1264_v24  ;;  %v2359_v31 = vpack.c.bf16 %v1271_v27, %v1269_v4 }
 0x189   :  { %v2607_v45 = vpop.eup %2606  ;;  %v1080_v43 = vadd.f32 1.0, %v2605_v34  ;;  %2336 = vmatprep.subr.bf16.mxu0 %v2335_v33  ;;  %v3122_v33 = vrot.slane %v3058_v17, %v358_v14  ;;  %v2361_v37 = vpack.c.bf16 %v1270_v32, %v1268_v26  ;;  %v1274_v34 = vld [vmem:[#allocation8 + $0x390] sm:$0xff]  ;;  %v2377_v24 = vpack.c.bf16 %v1286_v12, %v1284_v62  ;;  %v1296_v62 = vld [vmem:[#allocation8 + $0x440] sm:$0xff] }
 0x18a   :  { %v1081_v55 = vadd.f32 1.0, %v2607_v45  ;;  %1522 = vmatprep.mubr.f32.mxu0 %v1137_v44  ;;  %v3125_v36 = vrot.slane %v3058_v17, %v362_v28  ;;  %v1277_v44 = vld [vmem:[#allocation8 + $0x3a8] sm:$0xff]  ;;  %v1279_v45 = vld [vmem:[#allocation8 + $0x3b8] sm:$0xff]  ;;  %v2379_v27 = vpack.c.bf16 %v1291_v20, %v1289_v6  ;;  %v1288_v28 = vld [vmem:[#allocation8 + $0x400] sm:$0xff] }
 0x18b   :  { %1523 = vmatmul.mubr.f32.gmra.mrb[10].mxu0 %v1136_v39  ;;  %v1144_v41 = vmul.f32 %v1080_v43, %v888_v18  ;;  %v2363_v18 = vpack.c.bf16 %v1275_v35, %v1273_v30  ;;  %v1272_v39 = vld [vmem:[#allocation8 + $0x380] sm:$0xff]  ;;  %v2367_v53 = vpack.c.bf16 %v1279_v45, %v1277_v44  ;;  %v1293_v35 = vld [vmem:[#allocation8 + $0x428] sm:$0xff]  ;;  %v1298_v12 = vld [vmem:[#allocation8 + $0x450] sm:$0xff] }
 0x18c   :  { %v2609_v60 = vpop.eup %2608  ;;  %2338 = vmatpush1.bf16.msra.mxu0 %v2337_v42  ;;  %v1145_v51 = vmul.f32 %v1081_v55, %v889_v22  ;;  %v2365_v17 = vpack.c.bf16 %v1274_v34, %v1272_v39  ;;  %v1276_v55 = vld [vmem:[#allocation8 + $0x3a0] sm:$0xff]  ;;  %v1301_v6 = vld [vmem:[#allocation8 + $0x468] sm:$0xff]  ;;  %v1303_v20 = vld [vmem:[#allocation8 + $0x478] sm:$0xff] }
 0x18d   :  { %v2611_v63 = vpop.eup %2610  ;;  %v1088_v47 = vadd.f32 1.0, %v2609_v60  ;;  %2340 = vmatprep.subr.bf16.mxu0 %v2339_v48 }
 0x18e   :  { %v1089_v50 = vadd.f32 1.0, %v2611_v63  ;;  %1528 = vmatprep.mubr.f32.mxu0 %v1145_v51  ;;  %v2369_v51 = vpack.c.bf16 %v1278_v56, %v1276_v55 }
 0x18f   :  { %1529 = vmatmul.mubr.f32.gmra.mrb[12].mxu0 %v1144_v41  ;;  %v1152_v7 = vmul.f32 %v1088_v47, %v896_v59  ;;  %v1281_v59 = vld [vmem:[#allocation8 + $0x3c8] sm:$0xff]  ;;  %v1283_v41 = vld [vmem:[#allocation8 + $0x3d8] sm:$0xff] }
 0x190   :  { %2342 = vmatpush1.bf16.msra.mxu0 %v2341_v40  ;;  %v1153_v58 = vmul.f32 %v1089_v50, %v897_v61  ;;  %v2371_v47 = vpack.c.bf16 %v1283_v41, %v1281_v59  ;;  %v1294_v59 = vld [vmem:[#allocation8 + $0x430] sm:$0xff] }
 0x191   :  { %2344 = vmatprep.subr.bf16.mxu0 %v2343_v0  ;;  %v1280_v0 = vld [vmem:[#allocation8 + $0x3c0] sm:$0xff] }
 0x192   :  { %1534 = vmatprep.mubr.f32.mxu0 %v1153_v58 }
 0x193   :  { %1535 = vmatmul.mubr.f32.gmra.mrb[14].mxu0 %v1152_v7 }
 0x194   :  { %2346 = vmatpush1.bf16.msra.mxu0 %v2345_v54 }
 0x195   :  { %2348 = vmatprep.subr.bf16.mxu0 %v2347_v9  ;;  %v2373_v9 = vpack.c.bf16 %v1282_v1, %v1280_v0 }
 0x198   :  { %2350 = vmatpush1.bf16.msra.mxu0 %v2349_v2 }
 0x199   :  { %2352 = vmatprep.subr.bf16.mxu0 %v2351_v15 }
 0x19c   :  { %2354 = vmatpush1.bf16.msra.mxu0 %v2353_v23 }
 0x19d   :  { %2356 = vmatprep.subr.bf16.mxu0 %v2355_v46 }
 0x1a0   :  { %2358 = vmatpush1.bf16.msra.mxu0 %v2357_v29  ;;  %v1290_v29 = vld [vmem:[#allocation8 + $0x410] sm:$0xff] }
 0x1a1   :  { %v567_v38 = vpop.f32.mrb[16].mxu1  ;;  %2360 = vmatprep.subr.bf16.mxu0 %v2359_v31 }
 0x1a2   :  { %v3128_v22 = vadd.f32 %v567_v38, %v3122_v33  ;;  %v569_v42 = vpop.f32.mrb[17].mxu1 }
 0x1a3   :  { %v570_v43 = vadd.f32 %v569_v42, %v3125_v36 }
 0x1a4   :  { %v906_v48 = vmul.f32 0.70710677, %v3128_v22  ;;  %2362 = vmatpush1.bf16.msra.mxu0 %v2361_v37  ;;  %v1295_v37 = vld [vmem:[#allocation8 + $0x438] sm:$0xff]  ;;  %v842_v39 = vmul.f32 0.5, %v3128_v22 }
 0x1a5   :  { %v907_v52 = vmul.f32 0.70710677, %v570_v43  ;;  %2364 = vmatprep.subr.bf16.mxu0 %v2363_v18  ;;  %v573_v57 = vpop.f32.mrb[18].mxu1  ;;  %v843_v32 = vmul.f32 0.5, %v570_v43  ;;  %v2381_v43 = vpack.c.bf16 %v1290_v29, %v1288_v28  ;;  %v2383_v56 = vpack.c.bf16 %v1295_v37, %v1293_v35 }
 0x1a6   :  { %2612 = verf.f32 %v906_v48  ;;  %v574_v60 = vadd.f32 %v573_v57, %v3122_v33  ;;  %v575_v61 = vpop.f32.mrb[19].mxu1  ;;  %v1292_v57 = vld [vmem:[#allocation8 + $0x420] sm:$0xff] }
 0x1a7   :  { %2614 = verf.f32 %v907_v52  ;;  %v576_v40 = vadd.f32 %v575_v61, %v3125_v36  ;;  %v1297_v61 = vld [vmem:[#allocation8 + $0x448] sm:$0xff]  ;;  %v2385_v5 = vpack.c.bf16 %v1294_v59, %v1292_v57 }
 0x1a8   :  { %2366 = vmatpush1.bf16.msra.mxu0 %v2365_v17  ;;  %v914_v63 = vmul.f32 0.70710677, %v574_v60  ;;  %v850_v34 = vmul.f32 0.5, %v574_v60 }
 0x1a9   :  { %2368 = vmatprep.subr.bf16.mxu0 %v2367_v53  ;;  %v915_v3 = vmul.f32 0.70710677, %v576_v40  ;;  %v579_v50 = vpop.f32.mrb[20].mxu1  ;;  %v851_v48 = vmul.f32 0.5, %v576_v40 }
 0x1aa   :  { %2616 = verf.f32 %v914_v63  ;;  %v3135_v7 = vadd.f32 %v579_v50, %v3122_v33  ;;  %v581_v54 = vpop.f32.mrb[21].mxu1 }
 0x1ab   :  { %2618 = verf.f32 %v915_v3  ;;  %v3138_v58 = vadd.f32 %v581_v54, %v3125_v36 }
 0x1ac   :  { %2370 = vmatpush1.bf16.msra.mxu0 %v2369_v51  ;;  %v922_v8 = vmul.f32 0.70710677, %v3135_v7  ;;  %v1299_v51 = vld [vmem:[#allocation8 + $0x458] sm:$0xff] }
 0x1ad   :  { %2372 = vmatprep.subr.bf16.mxu0 %v2371_v47  ;;  %v923_v2 = vmul.f32 0.70710677, %v3138_v58  ;;  %v585_v15 = vpop.f32.mrb[22].mxu1  ;;  %v858_v47 = vmul.f32 0.5, %v3135_v7  ;;  %v859_v50 = vmul.f32 0.5, %v3138_v58 }
 0x1ae   :  { %2620 = verf.f32 %v922_v8  ;;  %v3143_v10 = vadd.f32 %v585_v15, %v3122_v33  ;;  %v587_v21 = vpop.f32.mrb[23].mxu1 }
 0x1af   :  { %2622 = verf.f32 %v923_v2  ;;  %v3146_v23 = vadd.f32 %v587_v21, %v3125_v36 }
 0x1b0   :  { %v2613_v46 = vpop.eup %2612  ;;  %2374 = vmatpush1.bf16.msra.mxu0 %v2373_v9  ;;  %v930_v25 = vmul.f32 0.70710677, %v3143_v10 }
 0x1b1   :  { %v2615_v14 = vpop.eup %2614  ;;  %v1034_v4 = vadd.f32 1.0, %v2613_v46  ;;  %2376 = vmatprep.subr.bf16.mxu0 %v2375_v11  ;;  %v931_v31 = vmul.f32 0.70710677, %v3146_v23  ;;  %v591_v26 = vpop.f32.mrb[24].mxu1  ;;  %v2387_v11 = vpack.c.bf16 %v1299_v51, %v1297_v61  ;;  %v866_v46 = vmul.f32 0.5, %v3143_v10  ;;  %v1302_v10 = vld [vmem:[#allocation8 + $0x470] sm:$0xff] }
 0x1b2   :  { %v1035_v30 = vadd.f32 1.0, %v2615_v14  ;;  %2624 = verf.f32 %v930_v25  ;;  %v3151_v38 = vadd.f32 %v591_v26, %v3122_v33  ;;  %v593_v18 = vpop.f32.mrb[25].mxu1  ;;  %v1309_v61 = vld [vmem:[#allocation8 + $0x4a8] sm:$0xff]  ;;  %v1311_v51 = vld [vmem:[#allocation8 + $0x4b8] sm:$0xff] }
 0x1b3   :  { %2626 = verf.f32 %v931_v31  ;;  %v3155_v42 = vadd.f32 %v593_v18, %v3125_v36  ;;  %v1098_v53 = vmul.f32 %v1034_v4, %v842_v39  ;;  %v867_v4 = vmul.f32 0.5, %v3146_v23  ;;  %v1305_v39 = vld [vmem:[#allocation8 + $0x488] sm:$0xff] }
 0x1b4   :  { %v2617_v44 = vpop.eup %2616  ;;  %2378 = vmatpush1.bf16.msra.mxu0 %v2377_v24  ;;  %v1099_v45 = vmul.f32 %v1035_v30, %v843_v32  ;;  %v938_v17 = vmul.f32 0.70710677, %v3151_v38  ;;  %v2391_v32 = vpack.c.bf16 %v1303_v20, %v1301_v6  ;;  %v1300_v30 = vld [vmem:[#allocation8 + $0x460] sm:$0xff] }
 0x1b5   :  { %v2619_v52 = vpop.eup %2618  ;;  %v1042_v55 = vadd.f32 1.0, %v2617_v44  ;;  %2380 = vmatprep.subr.bf16.mxu0 %v2379_v27  ;;  %v939_v22 = vmul.f32 0.70710677, %v3155_v42  ;;  %v597_v41 = vpop.f32.mrb[26].mxu1  ;;  %v2389_v27 = vpack.c.bf16 %v1298_v12, %v1296_v62  ;;  %v1315_v62 = vld [vmem:[#allocation8 + $0x4d8] sm:$0xff] }
 0x1b6   :  { %1605 = vmatprep.mubr.f32.mxu0 %v1099_v45  ;;  %v1043_v60 = vadd.f32 1.0, %v2619_v52  ;;  %2628 = verf.f32 %v938_v17  ;;  %v3160_v40 = vadd.f32 %v597_v41, %v3122_v33  ;;  %v599_v63 = vpop.f32.mrb[27].mxu1  ;;  %v874_v45 = vmul.f32 0.5, %v3151_v38  ;;  %v1306_v41 = vld [vmem:[#allocation8 + $0x490] sm:$0xff] }
 0x1b7   :  { %1606 = vmatmul.mubr.f32.vlgmr.msra.gmra.mrb[0].mxu0 %v1098_v53  ;;  %2630 = verf.f32 %v939_v22  ;;  %v3164_v0 = vadd.f32 %v599_v63, %v3125_v36  ;;  %v1106_v1 = vmul.f32 %v1042_v55, %v850_v34  ;;  %v1307_v34 = vld [vmem:[#allocation8 + $0x498] sm:$0xff]  ;;  %v875_v52 = vmul.f32 0.5, %v3155_v42  ;;  %v1304_v22 = vld [vmem:[#allocation8 + $0x480] sm:$0xff] }
 0x1b8   :  { %v2621_v3 = vpop.eup %2620  ;;  %2382 = vmatpush1.bf16.msra.mxu0 %v2381_v43  ;;  %v946_v49 = vmul.f32 0.70710677, %v3160_v40  ;;  %v1107_v54 = vmul.f32 %v1043_v60, %v851_v48  ;;  %v2393_v53 = vpack.c.bf16 %v1302_v10, %v1300_v30 }
 0x1b9   :  { %v2623_v9 = vpop.eup %2622  ;;  %v1050_v8 = vadd.f32 1.0, %v2621_v3  ;;  %2384 = vmatprep.subr.bf16.mxu0 %v2383_v56  ;;  %v947_v7 = vmul.f32 0.70710677, %v3164_v0  ;;  %v603_v2 = vpop.f32.mrb[28].mxu1 }
 0x1ba   :  { %v1051_v15 = vadd.f32 1.0, %v2623_v9  ;;  %2632 = verf.f32 %v946_v49  ;;  %v3170_v21 = vadd.f32 %v603_v2, %v3122_v33  ;;  %v605_v58 = vpop.f32.mrb[29].mxu1  ;;  %1611 = vmatprep.mubr.f32.mxu0 %v1107_v54  ;;  %v2399_v49 = vpack.c.bf16 %v1311_v51, %v1309_v61  ;;  %v1308_v54 = vld [vmem:[#allocation8 + $0x4a0] sm:$0xff]  ;;  %v1310_v9 = vld [vmem:[#allocation8 + $0x4b0] sm:$0xff] }
 0x1bb   :  { %2634 = verf.f32 %v947_v7  ;;  %v3174_v24 = vadd.f32 %v605_v58, %v3125_v36  ;;  %1612 = vmatmul.mubr.f32.gmra.mrb[2].mxu0 %v1106_v1  ;;  %v1114_v25 = vmul.f32 %v1050_v8, %v858_v47  ;;  %v883_v47 = vmul.f32 0.5, %v3164_v0  ;;  %v1330_v61 = vld [vmem:[#allocation8 + $0x550] sm:$0xff] }
 0x1bc   :  { %v2625_v14 = vpop.eup %2624  ;;  %2386 = vmatpush1.bf16.msra.mxu0 %v2385_v5  ;;  %v954_v28 = vmul.f32 0.70710677, %v3170_v21  ;;  %v1115_v29 = vmul.f32 %v1051_v15, %v859_v50  ;;  %v2397_v1 = vpack.c.bf16 %v1306_v41, %v1304_v22  ;;  %v2401_v2 = vpack.c.bf16 %v1310_v9, %v1308_v54  ;;  %v1331_v22 = vld [vmem:[#allocation8 + $0x558] sm:$0xff]  ;;  %v1337_v54 = vld [vmem:[#allocation8 + $0x588] sm:$0xff] }
 0x1bd   :  { %v2627_v31 = vpop.eup %2626  ;;  %v1058_v26 = vadd.f32 1.0, %v2625_v14  ;;  %2388 = vmatprep.subr.bf16.mxu0 %v2387_v11  ;;  %v955_v35 = vmul.f32 0.70710677, %v3174_v24  ;;  %v609_v37 = vpop.f32.mrb[30].mxu1  ;;  %v1313_v11 = vld [vmem:[#allocation8 + $0x4c8] sm:$0xff]  ;;  %v891_v0 = vmul.f32 0.5, %v3174_v24 }
 0x1be   :  { %v1059_v18 = vadd.f32 1.0, %v2627_v31  ;;  %2636 = verf.f32 %v954_v28  ;;  %v610_v44 = vadd.f32 %v609_v37, %v3122_v33  ;;  %v611_v23 = vpop.f32.mrb[31].mxu1  ;;  %1617 = vmatprep.mubr.f32.mxu0 %v1115_v29  ;;  %v2395_v33 = vpack.c.bf16 %v1307_v34, %v1305_v39  ;;  %v1318_v37 = vld [vmem:[#allocation8 + $0x4f0] sm:$0xff]  ;;  %v1321_v39 = vld [vmem:[#allocation8 + $0x508] sm:$0xff]  ;;  %v1323_v34 = vld [vmem:[#allocation8 + $0x518] sm:$0xff] }
 0x1bf   :  { %2638 = verf.f32 %v955_v35  ;;  %v612_v48 = vadd.f32 %v611_v23, %v3125_v36  ;;  %1618 = vmatmul.mubr.f32.gmra.mrb[4].mxu0 %v1114_v25  ;;  %v1122_v43 = vmul.f32 %v1058_v26, %v866_v46  ;;  %v882_v36 = vmul.f32 0.5, %v3160_v40  ;;  %v1312_v46 = vld [vmem:[#allocation8 + $0x4c0] sm:$0xff]  ;;  %v1314_v25 = vld [vmem:[#allocation8 + $0x4d0] sm:$0xff]  ;;  %v1339_v9 = vld [vmem:[#allocation8 + $0x598] sm:$0xff] }
 0x1c0   :  { %v2629_v17 = vpop.eup %2628  ;;  %2390 = vmatpush1.bf16.msra.mxu0 %v2389_v27  ;;  %v962_v55 = vmul.f32 0.70710677, %v610_v44  ;;  %v1123_v56 = vmul.f32 %v1059_v18, %v867_v4  ;;  %v890_v40 = vmul.f32 0.5, %v3170_v21  ;;  %v2403_v58 = vpack.c.bf16 %v1315_v62, %v1313_v11  ;;  %v1317_v4 = vld [vmem:[#allocation8 + $0x4e8] sm:$0xff]  ;;  %v1319_v27 = vld [vmem:[#allocation8 + $0x4f8] sm:$0xff]  ;;  %v1316_v35 = vld [vmem:[#allocation8 + $0x4e0] sm:$0xff] }
 0x1c1   :  { %v2631_v57 = vpop.eup %2630  ;;  %v1066_v59 = vadd.f32 1.0, %v2629_v17  ;;  %2392 = vmatprep.subr.bf16.mxu0 %v2391_v32  ;;  %v963_v60 = vmul.f32 0.70710677, %v612_v48  ;;  %v898_v28 = vmul.f32 0.5, %v610_v44  ;;  %v899_v31 = vmul.f32 0.5, %v612_v48  ;;  %v1320_v48 = vld [vmem:[#allocation8 + $0x500] sm:$0xff] }
 0x1c2   :  { %v1067_v38 = vadd.f32 1.0, %v2631_v57  ;;  %2640 = verf.f32 %v962_v55  ;;  %1623 = vmatprep.mubr.f32.mxu0 %v1123_v56  ;;  %v2405_v26 = vpack.c.bf16 %v1314_v25, %v1312_v46  ;;  %v2407_v10 = vpack.c.bf16 %v1319_v27, %v1317_v4  ;;  %v1322_v17 = vld [vmem:[#allocation8 + $0x510] sm:$0xff]  ;;  %v1324_v57 = vld [vmem:[#allocation8 + $0x520] sm:$0xff] }
 0x1c3   :  { %2642 = verf.f32 %v963_v60  ;;  %1624 = vmatmul.mubr.f32.gmra.mrb[6].mxu0 %v1122_v43  ;;  %v1130_v42 = vmul.f32 %v1066_v59, %v874_v45  ;;  %v2409_v44 = vpack.c.bf16 %v1318_v37, %v1316_v35  ;;  %v2411_v43 = vpack.c.bf16 %v1323_v34, %v1321_v39  ;;  %v1326_v59 = vld [vmem:[#allocation8 + $0x530] sm:$0xff]  ;;  %v1340_v4 = vld [vmem:[#allocation8 + $0x5a0] sm:$0xff]  ;;  %v1349_v34 = vld [vmem:[#allocation8 + $0x5e8] sm:$0xff] }
 0x1c4   :  { %v2633_v63 = vpop.eup %2632  ;;  %2394 = vmatpush1.bf16.msra.mxu0 %v2393_v53  ;;  %v1131_v3 = vmul.f32 %v1067_v38, %v875_v52  ;;  %v1325_v52 = vld [vmem:[#allocation8 + $0x528] sm:$0xff]  ;;  %v1327_v53 = vld [vmem:[#allocation8 + $0x538] sm:$0xff]  ;;  %v2413_v55 = vpack.c.bf16 %v1322_v17, %v1320_v48  ;;  %v2417_v41 = vpack.c.bf16 %v1326_v59, %v1324_v57  ;;  %v1328_v38 = vld [vmem:[#allocation8 + $0x540] sm:$0xff]  ;;  %v366_v51 = vsub.s32 4, %v3055_v13 }
 0x1c5   :  { %v2635_v50 = vpop.eup %2634  ;;  %v1074_v5 = vadd.f32 1.0, %v2633_v63  ;;  %2396 = vmatprep.subr.bf16.mxu0 %v2395_v33  ;;  %v2415_v56 = vpack.c.bf16 %v1327_v53, %v1325_v52  ;;  %v1329_v33 = vld [vmem:[#allocation8 + $0x548] sm:$0xff]  ;;  %v370_v63 = vsub.s32 5, %v3055_v13  ;;  %v1342_v27 = vld [vmem:[#allocation8 + $0x5b0] sm:$0xff]  ;;  %v1344_v35 = vld [vmem:[#allocation8 + $0x5c0] sm:$0xff] }
 0x1c6   :  { %v1075_v8 = vadd.f32 1.0, %v2635_v50  ;;  %1629 = vmatprep.mubr.f32.mxu0 %v1131_v3  ;;  %v2419_v60 = vpack.c.bf16 %v1331_v22, %v1329_v33  ;;  %v1332_v3 = vld [vmem:[#allocation8 + $0x560] sm:$0xff]  ;;  %v1334_v50 = vld [vmem:[#allocation8 + $0x570] sm:$0xff]  ;;  %v1353_v59 = vld [vmem:[#allocation8 + $0x608] sm:$0xff] }
 0x1c7   :  { %1630 = vmatmul.mubr.f32.gmra.mrb[8].mxu0 %v1130_v42  ;;  %v1138_v12 = vmul.f32 %v1074_v5, %v882_v36  ;;  %v1333_v36 = vld [vmem:[#allocation8 + $0x568] sm:$0xff]  ;;  %v1335_v42 = vld [vmem:[#allocation8 + $0x578] sm:$0xff]  ;;  %v2425_v11 = vpack.c.bf16 %v1334_v50, %v1332_v3  ;;  %v1346_v37 = vld [vmem:[#allocation8 + $0x5d0] sm:$0xff] }
 0x1c8   :  { %v2637_v7 = vpop.eup %2636  ;;  %2398 = vmatpush1.bf16.msra.mxu0 %v2397_v1  ;;  %v1139_v15 = vmul.f32 %v1075_v8, %v883_v47  ;;  %v2421_v47 = vpack.c.bf16 %v1330_v61, %v1328_v38  ;;  %v2423_v1 = vpack.c.bf16 %v1335_v42, %v1333_v36  ;;  %v3189_v5 = vld [vmem:[#allocation7] sm:$0xff]  ;;  %v2437_v48 = vpack.c.bf16 %v1346_v37, %v1344_v35  ;;  %v1348_v53 = vld [vmem:[#allocation8 + $0x5e0] sm:$0xff] }
 0x1c9   :  { %v2639_v6 = vpop.eup %2638  ;;  %v1082_v20 = vadd.f32 1.0, %v2637_v7  ;;  %2400 = vmatprep.subr.bf16.mxu0 %v2399_v49  ;;  %v3192_v49 = vrot.slane %v3189_v5, %v366_v51  ;;  %v3195_v8 = vrot.slane %v3189_v5, %v370_v63  ;;  %v1338_v7 = vld [vmem:[#allocation8 + $0x590] sm:$0xff]  ;;  %v1355_v33 = vld [vmem:[#allocation8 + $0x618] sm:$0xff] }
 0x1ca   :  { %v1083_v14 = vadd.f32 1.0, %v2639_v6  ;;  %1635 = vmatprep.mubr.f32.mxu0 %v1139_v15  ;;  %v1341_v15 = vld [vmem:[#allocation8 + $0x5a8] sm:$0xff]  ;;  %v1343_v6 = vld [vmem:[#allocation8 + $0x5b8] sm:$0xff]  ;;  %v2443_v63 = vpack.c.bf16 %v1355_v33, %v1353_v59 }
 0x1cb   :  { %1636 = vmatmul.mubr.f32.gmra.mrb[10].mxu0 %v1138_v12  ;;  %v1146_v21 = vmul.f32 %v1082_v20, %v890_v40  ;;  %v2427_v40 = vpack.c.bf16 %v1339_v9, %v1337_v54  ;;  %v1336_v12 = vld [vmem:[#allocation8 + $0x580] sm:$0xff]  ;;  %v1365_v33 = vld [vmem:[#allocation8 + $0x668] sm:$0xff] }
 0x1cc   :  { %v2641_v29 = vpop.eup %2640  ;;  %2402 = vmatpush1.bf16.msra.mxu0 %v2401_v2  ;;  %v1147_v24 = vmul.f32 %v1083_v14, %v891_v0  ;;  %v2429_v46 = vpack.c.bf16 %v1338_v7, %v1336_v12  ;;  %v2431_v14 = vpack.c.bf16 %v1343_v6, %v1341_v15 }
 0x1cd   :  { %v2643_v32 = vpop.eup %2642  ;;  %v1090_v30 = vadd.f32 1.0, %v2641_v29  ;;  %2404 = vmatprep.subr.bf16.mxu0 %v2403_v58  ;;  %v1347_v29 = vld [vmem:[#allocation8 + $0x5d8] sm:$0xff] }
 0x1ce   :  { %v1091_v18 = vadd.f32 1.0, %v2643_v32  ;;  %1641 = vmatprep.mubr.f32.mxu0 %v1147_v24  ;;  %v2433_v32 = vpack.c.bf16 %v1342_v27, %v1340_v4 }
 0x1cf   :  { %1642 = vmatmul.mubr.f32.gmra.mrb[12].mxu0 %v1146_v21  ;;  %v1154_v23 = vmul.f32 %v1090_v30, %v898_v28  ;;  %v1345_v21 = vld [vmem:[#allocation8 + $0x5c8] sm:$0xff] }
 0x1d0   :  { %2406 = vmatpush1.bf16.msra.mxu0 %v2405_v26  ;;  %v1155_v45 = vmul.f32 %v1091_v18, %v899_v31 }
 0x1d1   :  { %2408 = vmatprep.subr.bf16.mxu0 %v2407_v10  ;;  %v2435_v10 = vpack.c.bf16 %v1347_v29, %v1345_v21  ;;  %v1356_v21 = vld [vmem:[#allocation8 + $0x620] sm:$0xff]  ;;  %v1358_v29 = vld [vmem:[#allocation8 + $0x630] sm:$0xff] }
 0x1d2   :  { %1647 = vmatprep.mubr.f32.mxu0 %v1155_v45 }
 0x1d3   :  { %1648 = vmatmul.mubr.f32.gmra.mrb[14].mxu0 %v1154_v23  ;;  %v1351_v23 = vld [vmem:[#allocation8 + $0x5f8] sm:$0xff] }
 0x1d4   :  { %2410 = vmatpush1.bf16.msra.mxu0 %v2409_v44  ;;  %v2439_v52 = vpack.c.bf16 %v1351_v23, %v1349_v34  ;;  %v2449_v23 = vpack.c.bf16 %v1358_v29, %v1356_v21 }
 0x1d5   :  { %2412 = vmatprep.subr.bf16.mxu0 %v2411_v43 }
 0x1d8   :  { %2414 = vmatpush1.bf16.msra.mxu0 %v2413_v55  ;;  %v1350_v55 = vld [vmem:[#allocation8 + $0x5f0] sm:$0xff] }
 0x1d9   :  { %2416 = vmatprep.subr.bf16.mxu0 %v2415_v56  ;;  %v2441_v61 = vpack.c.bf16 %v1350_v55, %v1348_v53  ;;  %v1360_v55 = vld [vmem:[#allocation8 + $0x640] sm:$0xff] }
 0x1dc   :  { %2418 = vmatpush1.bf16.msra.mxu0 %v2417_v41 }
 0x1dd   :  { %2420 = vmatprep.subr.bf16.mxu0 %v2419_v60 }
 0x1e0   :  { %2422 = vmatpush1.bf16.msra.mxu0 %v2421_v47  ;;  %v1352_v47 = vld [vmem:[#allocation8 + $0x600] sm:$0xff] }
 0x1e1   :  { %v680_v62 = vpop.f32.mrb[32].mxu1  ;;  %2424 = vmatprep.subr.bf16.mxu0 %v2423_v1  ;;  %v1354_v1 = vld [vmem:[#allocation8 + $0x610] sm:$0xff] }
 0x1e2   :  { %v3198_v0 = vadd.f32 %v680_v62, %v3192_v49  ;;  %v682_v2 = vpop.f32.mrb[33].mxu1  ;;  %v1359_v62 = vld [vmem:[#allocation8 + $0x638] sm:$0xff] }
 0x1e3   :  { %v683_v20 = vadd.f32 %v682_v2, %v3195_v8 }
 0x1e4   :  { %v908_v58 = vmul.f32 0.70710677, %v3198_v0  ;;  %2426 = vmatpush1.bf16.msra.mxu0 %v2425_v11  ;;  %v1357_v11 = vld [vmem:[#allocation8 + $0x628] sm:$0xff]  ;;  %v844_v7 = vmul.f32 0.5, %v3198_v0 }
 0x1e5   :  { %v909_v25 = vmul.f32 0.70710677, %v683_v20  ;;  %2428 = vmatprep.subr.bf16.mxu0 %v2427_v40  ;;  %v686_v28 = vpop.f32.mrb[34].mxu1  ;;  %v845_v54 = vmul.f32 0.5, %v683_v20  ;;  %v2445_v20 = vpack.c.bf16 %v1354_v1, %v1352_v47 }
 0x1e6   :  { %2644 = verf.f32 %v908_v58  ;;  %v687_v31 = vadd.f32 %v686_v28, %v3192_v49  ;;  %v688_v26 = vpop.f32.mrb[35].mxu1  ;;  %v2447_v28 = vpack.c.bf16 %v1359_v62, %v1357_v11  ;;  %v1364_v11 = vld [vmem:[#allocation8 + $0x660] sm:$0xff] }
 0x1e7   :  { %2646 = verf.f32 %v909_v25  ;;  %v689_v24 = vadd.f32 %v688_v26, %v3195_v8 }
 0x1e8   :  { %2430 = vmatpush1.bf16.msra.mxu0 %v2429_v46  ;;  %v916_v30 = vmul.f32 0.70710677, %v687_v31  ;;  %v852_v2 = vmul.f32 0.5, %v687_v31 }
 0x1e9   :  { %2432 = vmatprep.subr.bf16.mxu0 %v2431_v14  ;;  %v917_v18 = vmul.f32 0.70710677, %v689_v24  ;;  %v692_v39 = vpop.f32.mrb[36].mxu1  ;;  %v853_v46 = vmul.f32 0.5, %v689_v24 }
 0x1ea   :  { %2648 = verf.f32 %v916_v30  ;;  %v3205_v44 = vadd.f32 %v692_v39, %v3192_v49  ;;  %v694_v45 = vpop.f32.mrb[37].mxu1  ;;  %v1363_v30 = vld [vmem:[#allocation8 + $0x658] sm:$0xff] }
 0x1eb   :  { %2650 = verf.f32 %v917_v18  ;;  %v3208_v43 = vadd.f32 %v694_v45, %v3195_v8 }
 0x1ec   :  { %2434 = vmatpush1.bf16.msra.mxu0 %v2433_v32  ;;  %v924_v17 = vmul.f32 0.70710677, %v3205_v44  ;;  %v1361_v32 = vld [vmem:[#allocation8 + $0x648] sm:$0xff]  ;;  %v860_v35 = vmul.f32 0.5, %v3205_v44 }
 0x1ed   :  { %2436 = vmatprep.subr.bf16.mxu0 %v2435_v10  ;;  %v925_v56 = vmul.f32 0.70710677, %v3208_v43  ;;  %v698_v57 = vpop.f32.mrb[38].mxu1  ;;  %v861_v34 = vmul.f32 0.5, %v3208_v43  ;;  %v2451_v53 = vpack.c.bf16 %v1363_v30, %v1361_v32  ;;  %v1373_v30 = vld [vmem:[#allocation8 + $0x6a8] sm:$0xff] }
 0x1ee   :  { %2652 = verf.f32 %v924_v17  ;;  %v3213_v22 = vadd.f32 %v698_v57, %v3192_v49  ;;  %v700_v41 = vpop.f32.mrb[39].mxu1 }
 0x1ef   :  { %2654 = verf.f32 %v925_v56  ;;  %v3216_v60 = vadd.f32 %v700_v41, %v3195_v8  ;;  %v1362_v56 = vld [vmem:[#allocation8 + $0x650] sm:$0xff]  ;;  %v1367_v41 = vld [vmem:[#allocation8 + $0x678] sm:$0xff] }
 0x1f0   :  { %v2645_v38 = vpop.eup %2644  ;;  %2438 = vmatpush1.bf16.msra.mxu0 %v2437_v48  ;;  %v932_v51 = vmul.f32 0.70710677, %v3213_v22  ;;  %v2453_v47 = vpack.c.bf16 %v1362_v56, %v1360_v55  ;;  %v1377_v55 = vld [vmem:[#allocation8 + $0x6c8] sm:$0xff]  ;;  %v1379_v56 = vld [vmem:[#allocation8 + $0x6d8] sm:$0xff] }
 0x1f1   :  { %v2647_v36 = vpop.eup %2646  ;;  %v1036_v42 = vadd.f32 1.0, %v2645_v38  ;;  %2440 = vmatprep.subr.bf16.mxu0 %v2439_v52  ;;  %v933_v3 = vmul.f32 0.70710677, %v3216_v60  ;;  %v704_v50 = vpop.f32.mrb[40].mxu1 }
 0x1f2   :  { %v1037_v9 = vadd.f32 1.0, %v2647_v36  ;;  %2656 = verf.f32 %v932_v51  ;;  %v3221_v40 = vadd.f32 %v704_v50, %v3192_v49  ;;  %v706_v12 = vpop.f32.mrb[41].mxu1 }
 0x1f3   :  { %2658 = verf.f32 %v933_v3  ;;  %v3225_v15 = vadd.f32 %v706_v12, %v3195_v8  ;;  %v1100_v4 = vmul.f32 %v1036_v42, %v844_v7 }
 0x1f4   :  { %v2649_v6 = vpop.eup %2648  ;;  %2442 = vmatpush1.bf16.msra.mxu0 %v2441_v61  ;;  %v1101_v58 = vmul.f32 %v1037_v9, %v845_v54  ;;  %v940_v25 = vmul.f32 0.70710677, %v3221_v40  ;;  %v868_v61 = vmul.f32 0.5, %v3213_v22  ;;  %v2455_v9 = vpack.c.bf16 %v1367_v41, %v1365_v33  ;;  %v1366_v22 = vld [vmem:[#allocation8 + $0x670] sm:$0xff] }
 0x1f5   :  { %v2651_v14 = vpop.eup %2650  ;;  %v1044_v27 = vadd.f32 1.0, %v2649_v6  ;;  %2444 = vmatprep.subr.bf16.mxu0 %v2443_v63  ;;  %v941_v0 = vmul.f32 0.70710677, %v3225_v15  ;;  %v710_v31 = vpop.f32.mrb[42].mxu1  ;;  %v869_v63 = vmul.f32 0.5, %v3216_v60  ;;  %v1371_v6 = vld [vmem:[#allocation8 + $0x698] sm:$0xff] }
 0x1f6   :  { %1718 = vmatprep.mubr.f32.mxu0 %v1101_v58  ;;  %v1045_v26 = vadd.f32 1.0, %v2651_v14  ;;  %2660 = verf.f32 %v940_v25  ;;  %v3230_v24 = vadd.f32 %v710_v31, %v3192_v49  ;;  %v712_v10 = vpop.f32.mrb[43].mxu1  ;;  %v1368_v31 = vld [vmem:[#allocation8 + $0x680] sm:$0xff] }
 0x1f7   :  { %1719 = vmatmul.mubr.f32.vlgmr.msra.gmra.mrb[0].mxu0 %v1100_v4  ;;  %2662 = verf.f32 %v941_v0  ;;  %v3234_v37 = vadd.f32 %v712_v10, %v3195_v8  ;;  %v1108_v18 = vmul.f32 %v1044_v27, %v852_v2  ;;  %v1369_v2 = vld [vmem:[#allocation8 + $0x688] sm:$0xff]  ;;  %v877_v4 = vmul.f32 0.5, %v3225_v15  ;;  %v1375_v10 = vld [vmem:[#allocation8 + $0x6b8] sm:$0xff] }
 0x1f8   :  { %v2653_v39 = vpop.eup %2652  ;;  %2446 = vmatpush1.bf16.msra.mxu0 %v2445_v20  ;;  %v948_v45 = vmul.f32 0.70710677, %v3230_v24  ;;  %v1109_v48 = vmul.f32 %v1045_v26, %v853_v46  ;;  %v876_v46 = vmul.f32 0.5, %v3221_v40  ;;  %v2457_v27 = vpack.c.bf16 %v1366_v22, %v1364_v11  ;;  %v1370_v26 = vld [vmem:[#allocation8 + $0x690] sm:$0xff] }
 0x1f9   :  { %v2655_v17 = vpop.eup %2654  ;;  %v1052_v52 = vadd.f32 1.0, %v2653_v39  ;;  %2448 = vmatprep.subr.bf16.mxu0 %v2447_v28  ;;  %v949_v44 = vmul.f32 0.70710677, %v3234_v37  ;;  %v716_v57 = vpop.f32.mrb[44].mxu1  ;;  %v2461_v39 = vpack.c.bf16 %v1370_v26, %v1368_v31  ;;  %v1393_v31 = vld [vmem:[#allocation8 + $0x748] sm:$0xff]  ;;  %v1395_v26 = vld [vmem:[#allocation8 + $0x758] sm:$0xff] }
 0x1fa   :  { %v1053_v59 = vadd.f32 1.0, %v2655_v17  ;;  %2664 = verf.f32 %v948_v45  ;;  %v3240_v38 = vadd.f32 %v716_v57, %v3192_v49  ;;  %v718_v43 = vpop.f32.mrb[45].mxu1  ;;  %1724 = vmatprep.mubr.f32.mxu0 %v1109_v48  ;;  %v2463_v48 = vpack.c.bf16 %v1375_v10, %v1373_v30  ;;  %v1372_v17 = vld [vmem:[#allocation8 + $0x6a0] sm:$0xff]  ;;  %v1394_v10 = vld [vmem:[#allocation8 + $0x750] sm:$0xff] }
 0x1fb   :  { %2666 = verf.f32 %v949_v44  ;;  %v3244_v51 = vadd.f32 %v718_v43, %v3195_v8  ;;  %1725 = vmatmul.mubr.f32.gmra.mrb[2].mxu0 %v1108_v18  ;;  %v1116_v36 = vmul.f32 %v1052_v52, %v860_v35  ;;  %v885_v18 = vmul.f32 0.5, %v3234_v37  ;;  %v1374_v52 = vld [vmem:[#allocation8 + $0x6b0] sm:$0xff]  ;;  %v1392_v30 = vld [vmem:[#allocation8 + $0x740] sm:$0xff] }
 0x1fc   :  { %v2657_v42 = vpop.eup %2656  ;;  %2450 = vmatpush1.bf16.msra.mxu0 %v2449_v23  ;;  %v956_v1 = vmul.f32 0.70710677, %v3240_v38  ;;  %v1117_v3 = vmul.f32 %v1053_v59, %v861_v34  ;;  %v2465_v59 = vpack.c.bf16 %v1374_v52, %v1372_v17  ;;  %v1401_v17 = vld [vmem:[#allocation8 + $0x788] sm:$0xff]  ;;  %v1403_v52 = vld [vmem:[#allocation8 + $0x798] sm:$0xff] }
 0x1fd   :  { %v2659_v50 = vpop.eup %2658  ;;  %v1060_v54 = vadd.f32 1.0, %v2657_v42  ;;  %2452 = vmatprep.subr.bf16.mxu0 %v2451_v53  ;;  %v957_v62 = vmul.f32 0.70710677, %v3244_v51  ;;  %v722_v12 = vpop.f32.mrb[46].mxu1  ;;  %v893_v37 = vmul.f32 0.5, %v3244_v51  ;;  %v1378_v42 = vld [vmem:[#allocation8 + $0x6d0] sm:$0xff] }
 0x1fe   :  { %v1061_v7 = vadd.f32 1.0, %v2659_v50  ;;  %2668 = verf.f32 %v956_v1  ;;  %v723_v58 = vadd.f32 %v722_v12, %v3192_v49  ;;  %v724_v60 = vpop.f32.mrb[47].mxu1  ;;  %1730 = vmatprep.mubr.f32.mxu0 %v1117_v3  ;;  %v2459_v49 = vpack.c.bf16 %v1371_v6, %v1369_v2  ;;  %v1383_v1 = vld [vmem:[#allocation8 + $0x6f8] sm:$0xff]  ;;  %v1380_v12 = vld [vmem:[#allocation8 + $0x6e0] sm:$0xff]  ;;  %v1385_v6 = vld [vmem:[#allocation8 + $0x708] sm:$0xff] }
 0x1ff   :  { %2670 = verf.f32 %v957_v62  ;;  %v725_v20 = vadd.f32 %v724_v60, %v3195_v8  ;;  %1731 = vmatmul.mubr.f32.gmra.mrb[4].mxu0 %v1116_v36  ;;  %v1124_v25 = vmul.f32 %v1060_v54, %v868_v61  ;;  %v884_v8 = vmul.f32 0.5, %v3230_v24  ;;  %v1376_v36 = vld [vmem:[#allocation8 + $0x6c0] sm:$0xff]  ;;  %v1387_v60 = vld [vmem:[#allocation8 + $0x718] sm:$0xff] }
 0x200   :  { %v2661_v14 = vpop.eup %2660  ;;  %2454 = vmatpush1.bf16.msra.mxu0 %v2453_v47  ;;  %v964_v28 = vmul.f32 0.70710677, %v723_v58  ;;  %v1125_v21 = vmul.f32 %v1061_v7, %v869_v63  ;;  %v892_v24 = vmul.f32 0.5, %v3240_v38  ;;  %v2467_v61 = vpack.c.bf16 %v1379_v56, %v1377_v55  ;;  %v1381_v47 = vld [vmem:[#allocation8 + $0x6e8] sm:$0xff]  ;;  %v1382_v7 = vld [vmem:[#allocation8 + $0x6f0] sm:$0xff] }
 0x201   :  { %v2663_v29 = vpop.eup %2662  ;;  %v1068_v0 = vadd.f32 1.0, %v2661_v14  ;;  %2456 = vmatprep.subr.bf16.mxu0 %v2455_v9  ;;  %v965_v32 = vmul.f32 0.70710677, %v725_v20  ;;  %v900_v3 = vmul.f32 0.5, %v723_v58  ;;  %v901_v54 = vmul.f32 0.5, %v725_v20  ;;  %v1384_v20 = vld [vmem:[#allocation8 + $0x700] sm:$0xff] }
 0x202   :  { %v1069_v40 = vadd.f32 1.0, %v2663_v29  ;;  %2672 = verf.f32 %v964_v28  ;;  %1736 = vmatprep.mubr.f32.mxu0 %v1125_v21  ;;  %v2469_v9 = vpack.c.bf16 %v1378_v42, %v1376_v36  ;;  %v2471_v62 = vpack.c.bf16 %v1383_v1, %v1381_v47  ;;  %v1391_v28 = vld [vmem:[#allocation8 + $0x738] sm:$0xff]  ;;  %v1404_v47 = vld [vmem:[#allocation8 + $0x7a0] sm:$0xff]  ;;  %v1406_v1 = vld [vmem:[#allocation8 + $0x7b0] sm:$0xff] }
 0x203   :  { %2674 = verf.f32 %v965_v32  ;;  %1737 = vmatmul.mubr.f32.gmra.mrb[6].mxu0 %v1124_v25  ;;  %v1132_v15 = vmul.f32 %v1068_v0, %v876_v46  ;;  %v2473_v58 = vpack.c.bf16 %v1382_v7, %v1380_v12  ;;  %v2475_v14 = vpack.c.bf16 %v1387_v60, %v1385_v6  ;;  %v1388_v0 = vld [vmem:[#allocation8 + $0x720] sm:$0xff] }
 0x204   :  { %v2665_v35 = vpop.eup %2664  ;;  %2458 = vmatpush1.bf16.msra.mxu0 %v2457_v27  ;;  %v1133_v34 = vmul.f32 %v1069_v40, %v877_v4  ;;  %v1386_v4 = vld [vmem:[#allocation8 + $0x710] sm:$0xff]  ;;  %v1389_v27 = vld [vmem:[#allocation8 + $0x728] sm:$0xff]  ;;  %v2483_v40 = vpack.c.bf16 %v1395_v26, %v1393_v31  ;;  %v1408_v7 = vld [vmem:[#allocation8 + $0x7c0] sm:$0xff] }
 0x205   :  { %v2667_v23 = vpop.eup %2666  ;;  %v1076_v45 = vadd.f32 1.0, %v2665_v35  ;;  %2460 = vmatprep.subr.bf16.mxu0 %v2459_v49  ;;  %v2477_v21 = vpack.c.bf16 %v1386_v4, %v1384_v20  ;;  %v2479_v29 = vpack.c.bf16 %v1391_v28, %v1389_v27  ;;  %v1390_v49 = vld [vmem:[#allocation8 + $0x730] sm:$0xff]  ;;  %v1399_v35 = vld [vmem:[#allocation8 + $0x778] sm:$0xff] }
 0x206   :  { %v1077_v53 = vadd.f32 1.0, %v2667_v23  ;;  %1742 = vmatprep.mubr.f32.mxu0 %v1133_v34  ;;  %v2481_v32 = vpack.c.bf16 %v1390_v49, %v1388_v0  ;;  %v1396_v23 = vld [vmem:[#allocation8 + $0x760] sm:$0xff] }
 0x207   :  { %1743 = vmatmul.mubr.f32.gmra.mrb[8].mxu0 %v1132_v15  ;;  %v1140_v44 = vmul.f32 %v1076_v45, %v884_v8  ;;  %v374_v8 = vsub.s32 6, %v3055_v13  ;;  %v1397_v15 = vld [vmem:[#allocation8 + $0x768] sm:$0xff]  ;;  %v1398_v45 = vld [vmem:[#allocation8 + $0x770] sm:$0xff] }
 0x208   :  { %v2669_v57 = vpop.eup %2668  ;;  %2462 = vmatpush1.bf16.msra.mxu0 %v2461_v39  ;;  %v1141_v33 = vmul.f32 %v1077_v53, %v885_v18  ;;  %v378_v18 = vsub.s32 7, %v3055_v13  ;;  %v2485_v39 = vpack.c.bf16 %v1394_v10, %v1392_v30  ;;  %v2487_v34 = vpack.c.bf16 %v1399_v35, %v1397_v15 }
 0x209   :  { %v2671_v41 = vpop.eup %2670  ;;  %v1084_v43 = vadd.f32 1.0, %v2669_v57  ;;  %2464 = vmatprep.subr.bf16.mxu0 %v2463_v48  ;;  %v3260_v48 = vrot.slane %v3189_v5, %v374_v8  ;;  %v2489_v55 = vpack.c.bf16 %v1398_v45, %v1396_v23  ;;  %v1402_v57 = vld [vmem:[#allocation8 + $0x790] sm:$0xff] }
 0x20a   :  { %v1085_v63 = vadd.f32 1.0, %v2671_v41  ;;  %1748 = vmatprep.mubr.f32.mxu0 %v1141_v33  ;;  %v3263_v53 = vrot.slane %v3189_v5, %v378_v18  ;;  %v1405_v33 = vld [vmem:[#allocation8 + $0x7a8] sm:$0xff]  ;;  %v1407_v41 = vld [vmem:[#allocation8 + $0x7b8] sm:$0xff] }
 0x20b   :  { %1749 = vmatmul.mubr.f32.gmra.mrb[10].mxu0 %v1140_v44  ;;  %v1148_v38 = vmul.f32 %v1084_v43, %v892_v24  ;;  %v2491_v24 = vpack.c.bf16 %v1403_v52, %v1401_v17  ;;  %v1400_v44 = vld [vmem:[#allocation8 + $0x780] sm:$0xff] }
 0x20c   :  { %v2673_v50 = vpop.eup %2672  ;;  %2466 = vmatpush1.bf16.msra.mxu0 %v2465_v59  ;;  %v1149_v51 = vmul.f32 %v1085_v63, %v893_v37  ;;  %v2493_v5 = vpack.c.bf16 %v1402_v57, %v1400_v44  ;;  %v2495_v63 = vpack.c.bf16 %v1407_v41, %v1405_v33 }
 0x20d   :  { %v2675_v11 = vpop.eup %2674  ;;  %v1092_v22 = vadd.f32 1.0, %v2673_v50  ;;  %2468 = vmatprep.subr.bf16.mxu0 %v2467_v61  ;;  %v1409_v50 = vld [vmem:[#allocation8 + $0x7c8] sm:$0xff] }
 0x20e   :  { %v1093_v2 = vadd.f32 1.0, %v2675_v11  ;;  %1754 = vmatprep.mubr.f32.mxu0 %v1149_v51  ;;  %v2497_v11 = vpack.c.bf16 %v1406_v1, %v1404_v47 }
 0x20f   :  { %1755 = vmatmul.mubr.f32.gmra.mrb[12].mxu0 %v1148_v38  ;;  %v1156_v46 = vmul.f32 %v1092_v22, %v900_v3 }
 0x210   :  { %2470 = vmatpush1.bf16.msra.mxu0 %v2469_v9  ;;  %v1157_v25 = vmul.f32 %v1093_v2, %v901_v54  ;;  %v1411_v54 = vld [vmem:[#allocation8 + $0x7d8] sm:$0xff]  ;;  %v1410_v2 = vld [vmem:[#allocation8 + $0x7d0] sm:$0xff] }
 0x211   :  { %2472 = vmatprep.subr.bf16.mxu0 %v2471_v62  ;;  %v2499_v12 = vpack.c.bf16 %v1411_v54, %v1409_v50  ;;  %v2501_v20 = vpack.c.bf16 %v1410_v2, %v1408_v7 }
 0x212   :  { %1760 = vmatprep.mubr.f32.mxu0 %v1157_v25 }
 0x213   :  { %1761 = vmatmul.mubr.f32.gmra.mrb[14].mxu0 %v1156_v46  ;;  %v1413_v46 = vld [vmem:[#allocation8 + $0x7e8] sm:$0xff] }
 0x214   :  { %2474 = vmatpush1.bf16.msra.mxu0 %v2473_v58  ;;  %v1415_v58 = vld [vmem:[#allocation8 + $0x7f8] sm:$0xff] }
 0x215   :  { %2476 = vmatprep.subr.bf16.mxu0 %v2475_v14  ;;  %v2503_v28 = vpack.c.bf16 %v1415_v58, %v1413_v46 }
 0x218   :  { %2478 = vmatpush1.bf16.msra.mxu0 %v2477_v21  ;;  %v1412_v21 = vld [vmem:[#allocation8 + $0x7e0] sm:$0xff] }
 0x219   :  { %2480 = vmatprep.subr.bf16.mxu0 %v2479_v29  ;;  %v1414_v29 = vld [vmem:[#allocation8 + $0x7f0] sm:$0xff] }
 0x21c   :  { %2482 = vmatpush1.bf16.msra.mxu0 %v2481_v32 }
 0x21d   :  { %2484 = vmatprep.subr.bf16.mxu0 %v2483_v40  ;;  %v2505_v40 = vpack.c.bf16 %v1414_v29, %v1412_v21 }
 0x220   :  { %2486 = vmatpush1.bf16.msra.mxu0 %v2485_v39 }
 0x221   :  { %v793_v56 = vpop.f32.mrb[48].mxu1  ;;  %2488 = vmatprep.subr.bf16.mxu0 %v2487_v34 }
 0x222   :  { %v3266_v37 = vadd.f32 %v793_v56, %v3260_v48  ;;  %v795_v59 = vpop.f32.mrb[49].mxu1 }
 0x223   :  { %v796_v43 = vadd.f32 %v795_v59, %v3263_v53 }
 0x224   :  { %v910_v61 = vmul.f32 0.70710677, %v3266_v37  ;;  %2490 = vmatpush1.bf16.msra.mxu0 %v2489_v55  ;;  %v846_v23 = vmul.f32 0.5, %v3266_v37 }
 0x225   :  { %v911_v36 = vmul.f32 0.70710677, %v796_v43  ;;  %v799_v42 = vpop.f32.mrb[50].mxu1  ;;  %2492 = vmatprep.subr.bf16.mxu0 %v2491_v24  ;;  %v847_v35 = vmul.f32 0.5, %v796_v43 }
 0x226   :  { %2676 = verf.f32 %v910_v61  ;;  %v3271_v3 = vadd.f32 %v799_v42, %v3260_v48  ;;  %v801_v38 = vpop.f32.mrb[51].mxu1 }
 0x227   :  { %2678 = verf.f32 %v911_v36  ;;  %v802_v9 = vadd.f32 %v801_v38, %v3263_v53 }
 0x228   :  { %v918_v51 = vmul.f32 0.70710677, %v3271_v3  ;;  %2494 = vmatpush1.bf16.msra.mxu0 %v2493_v5  ;;  %v854_v61 = vmul.f32 0.5, %v3271_v3 }
 0x229   :  { %v919_v22 = vmul.f32 0.70710677, %v802_v9  ;;  %v805_v62 = vpop.f32.mrb[52].mxu1  ;;  %2496 = vmatprep.subr.bf16.mxu0 %v2495_v63  ;;  %v855_v33 = vmul.f32 0.5, %v802_v9 }
 0x22a   :  { %2680 = verf.f32 %v918_v51  ;;  %v3276_v6 = vadd.f32 %v805_v62, %v3260_v48  ;;  %v807_v60 = vpop.f32.mrb[53].mxu1 }
 0x22b   :  { %2682 = verf.f32 %v919_v22  ;;  %v808_v25 = vadd.f32 %v807_v60, %v3263_v53 }
 0x22c   :  { %v926_v14 = vmul.f32 0.70710677, %v3276_v6  ;;  %2498 = vmatpush1.bf16.msra.mxu0 %v2497_v11  ;;  %v862_v3 = vmul.f32 0.5, %v3276_v6 }
 0x22d   :  { %v927_v4 = vmul.f32 0.70710677, %v808_v25  ;;  %v811_v27 = vpop.f32.mrb[54].mxu1  ;;  %2500 = vmatprep.subr.bf16.mxu0 %v2499_v12  ;;  %v863_v9 = vmul.f32 0.5, %v808_v25 }
 0x22e   :  { %2684 = verf.f32 %v926_v14  ;;  %v3281_v0 = vadd.f32 %v811_v27, %v3260_v48  ;;  %v813_v49 = vpop.f32.mrb[55].mxu1 }
 0x22f   :  { %2686 = verf.f32 %v927_v4  ;;  %v3284_v31 = vadd.f32 %v813_v49, %v3263_v53 }
 0x230   :  { %v2677_v26 = vpop.eup %2676  ;;  %v934_v32 = vmul.f32 0.70710677, %v3281_v0  ;;  %2502 = vmatpush1.bf16.msra.mxu0 %v2501_v20  ;;  %v870_v6 = vmul.f32 0.5, %v3281_v0 }
 0x231   :  { %v2679_v30 = vpop.eup %2678  ;;  %v1038_v10 = vadd.f32 1.0, %v2677_v26  ;;  %v935_v8 = vmul.f32 0.70710677, %v3284_v31  ;;  %v817_v15 = vpop.f32.mrb[56].mxu1  ;;  %2504 = vmatprep.subr.bf16.mxu0 %v2503_v28  ;;  %v871_v20 = vmul.f32 0.5, %v3284_v31 }
 0x232   :  { %v1039_v18 = vadd.f32 1.0, %v2679_v30  ;;  %2688 = verf.f32 %v934_v32  ;;  %v3289_v39 = vadd.f32 %v817_v15, %v3260_v48  ;;  %v819_v34 = vpop.f32.mrb[57].mxu1 }
 0x233   :  { %2690 = verf.f32 %v935_v8  ;;  %v3293_v45 = vadd.f32 %v819_v34, %v3263_v53  ;;  %v1102_v24 = vmul.f32 %v1038_v10, %v846_v23 }
 0x234   :  { %v2681_v17 = vpop.eup %2680  ;;  %v942_v52 = vmul.f32 0.70710677, %v3289_v39  ;;  %2506 = vmatpush1.bf16.msra.mxu0 %v2505_v40  ;;  %v1103_v55 = vmul.f32 %v1039_v18, %v847_v35 }
 0x235   :  { %v2683_v56 = vpop.eup %2682  ;;  %v1046_v44 = vadd.f32 1.0, %v2681_v17  ;;  %v943_v57 = vmul.f32 0.70710677, %v3293_v45  ;;  %v823_v59 = vpop.f32.mrb[58].mxu1  ;;  %v879_v31 = vmul.f32 0.5, %v3293_v45 }
 0x236   :  { %v1047_v41 = vadd.f32 1.0, %v2683_v56  ;;  %2692 = verf.f32 %v942_v52  ;;  %v3298_v37 = vadd.f32 %v823_v59, %v3260_v48  ;;  %v825_v43 = vpop.f32.mrb[59].mxu1  ;;  %1831 = vmatprep.mubr.f32.mxu0 %v1103_v55 }
 0x237   :  { %2694 = verf.f32 %v943_v57  ;;  %v826_v5 = vadd.f32 %v825_v43, %v3263_v53  ;;  %1832 = vmatmul.mubr.f32.vlgmr.msra.gmra.mrb[0].mxu0 %v1102_v24  ;;  %v1110_v54 = vmul.f32 %v1046_v44, %v854_v61 }
 0x238   :  { %v2685_v36 = vpop.eup %2684  ;;  %v950_v42 = vmul.f32 0.70710677, %v3298_v37  ;;  %v1111_v63 = vmul.f32 %v1047_v41, %v855_v33  ;;  %v886_v17 = vmul.f32 0.5, %v3298_v37 }
 0x239   :  { %v2687_v47 = vpop.eup %2686  ;;  %v1054_v1 = vadd.f32 1.0, %v2685_v36  ;;  %v951_v38 = vmul.f32 0.70710677, %v826_v5  ;;  %v829_v50 = vpop.f32.mrb[60].mxu1  ;;  %v887_v34 = vmul.f32 0.5, %v826_v5 }
 0x23a   :  { %v1055_v51 = vadd.f32 1.0, %v2687_v47  ;;  %2696 = verf.f32 %v950_v42  ;;  %v830_v11 = vadd.f32 %v829_v50, %v3260_v48  ;;  %v831_v22 = vpop.f32.mrb[61].mxu1  ;;  %1837 = vmatprep.mubr.f32.mxu0 %v1111_v63  ;;  %v1416_v47 = vld [vmem:[%s3367_s4] sm:$0x3]  ;;  %s2883_s4 = smov [#allocation10]  }
 0x23b   :  { %2698 = verf.f32 %v951_v38  ;;  %v832_v62 = vadd.f32 %v831_v22, %v3263_v53  ;;  %1838 = vmatmul.mubr.f32.gmra.mrb[2].mxu0 %v1110_v54  ;;  %v1118_v25 = vmul.f32 %v1054_v1, %v862_v3  ;;  %v3318_v1 = vrot.slane %v1416_v47, %v350_v16  ;;  %s1981_s19 = sshll.u32 %s2883_s4, 4  ;;  %s1982_s19 = int_to_ptr.vmem [resolvable:$true] %s1981_s19 }
 0x23c   :  { %v2689_v12 = vpop.eup %2688  ;;  %v958_v7 = vmul.f32 0.70710677, %v830_v11  ;;  %v1119_v2 = vmul.f32 %v1055_v51, %v863_v9  ;;  %v894_v57 = vmul.f32 0.5, %v830_v11  ;;  %v3322_v38 = vrot.slane %v1416_v47, %v354_v19  ;;  %s2845_s20 = scalar_lea.vmem %s1982_s19, 2048  ;;  %p2850_p5 = scmp.lt.s32.totalorder %s1982_s19, %s1982_s19 }
 0x23d   :  { %v2691_v60 = vpop.eup %2690  ;;  %v1062_v46 = vadd.f32 1.0, %v2689_v12  ;;  %v959_v58 = vmul.f32 0.70710677, %v832_v62  ;;  %v835_v14 = vpop.f32.mrb[62].mxu1  ;;  %v895_v44 = vmul.f32 0.5, %v832_v62  ;;  %p2846_p4 = scmp.ne.s32.totalorder %s1982_s19, %s2845_s20  ;;  %p2851_p6 = scmp.lt.s32.totalorder %s2845_s20, %s2845_s20 }
 0x23e   :  { %v1063_v4 = vadd.f32 1.0, %v2691_v60  ;;  %2700 = verf.f32 %v958_v7  ;;  %v836_v27 = vadd.f32 %v835_v14, %v3260_v48  ;;  %v837_v28 = vpop.f32.mrb[63].mxu1  ;;  %1843 = vmatprep.mubr.f32.mxu0 %v1119_v2  ;;  %v878_v48 = vmul.f32 0.5, %v3289_v39 }
 0x23f   :  { %2702 = verf.f32 %v959_v58  ;;  %v838_v21 = vadd.f32 %v837_v28, %v3263_v53  ;;  %1844 = vmatmul.mubr.f32.gmra.mrb[4].mxu0 %v1118_v25  ;;  %v1126_v10 = vmul.f32 %v1062_v46, %v870_v6  ;;  %p2852_p7 = por %p2851_p6, %p2850_p5 }
 0x240   :  { %v2693_v29 = vpop.eup %2692  ;;  %v966_v49 = vmul.f32 0.70710677, %v836_v27  ;;  %v1127_v26 = vmul.f32 %v1063_v4, %v871_v20  ;;  %v902_v37 = vmul.f32 0.5, %v836_v27 }
 0x241   :  { %v2695_v32 = vpop.eup %2694  ;;  %v1070_v40 = vadd.f32 1.0, %v2693_v29  ;;  %v967_v30 = vmul.f32 0.70710677, %v838_v21  ;;  %v903_v5 = vmul.f32 0.5, %v838_v21  ;;  %p2853_p8 = pnand %p2852_p7, %p2846_p4 }
 0x242   :  { %v1071_v8 = vadd.f32 1.0, %v2695_v32  ;;  %2704 = verf.f32 %v966_v49  ;;  %1849 = vmatprep.mubr.f32.mxu0 %v1127_v26 }
 0x243   :  { %2706 = verf.f32 %v967_v30  ;;  %1850 = vmatmul.mubr.f32.gmra.mrb[6].mxu0 %v1126_v10  ;;  %v1134_v18 = vmul.f32 %v1070_v40, %v878_v48 }
 0x244   :  { %v2697_v0 = vpop.eup %2696  ;;  %v1135_v15 = vmul.f32 %v1071_v8, %v879_v31 }
 0x245   :  { %v2699_v53 = vpop.eup %2698  ;;  %v1078_v35 = vadd.f32 1.0, %v2697_v0 }
 0x246   :  { %v1079_v23 = vadd.f32 1.0, %v2699_v53  ;;  %1855 = vmatprep.mubr.f32.mxu0 %v1135_v15 }
 0x247   :  { %1856 = vmatmul.mubr.f32.gmra.mrb[8].mxu0 %v1134_v18  ;;  %v1142_v24 = vmul.f32 %v1078_v35, %v886_v17 }
 0x248   :  { %v2701_v52 = vpop.eup %2700  ;;  %v1143_v45 = vmul.f32 %v1079_v23, %v887_v34 }
 0x249   :  { %v2703_v55 = vpop.eup %2702  ;;  %v1086_v56 = vadd.f32 1.0, %v2701_v52 }
 0x24a   :  { %v1087_v39 = vadd.f32 1.0, %v2703_v55  ;;  %1861 = vmatprep.mubr.f32.mxu0 %v1143_v45 }
 0x24b   :  { %1862 = vmatmul.mubr.f32.gmra.mrb[10].mxu0 %v1142_v24  ;;  %v1150_v61 = vmul.f32 %v1086_v56, %v894_v57 }
 0x24c   :  { %v2705_v59 = vpop.eup %2704  ;;  %v1151_v33 = vmul.f32 %v1087_v39, %v895_v44 }
 0x24d   :  { %v2707_v41 = vpop.eup %2706  ;;  %v1094_v43 = vadd.f32 1.0, %v2705_v59 }
 0x24e   :  { %v1095_v36 = vadd.f32 1.0, %v2707_v41  ;;  %1867 = vmatprep.mubr.f32.mxu0 %v1151_v33 }
 0x24f   :  { %1868 = vmatmul.mubr.f32.gmra.mrb[12].mxu0 %v1150_v61  ;;  %v1158_v63 = vmul.f32 %v1094_v43, %v902_v37 }
 0x250   :  { %v1159_v42 = vmul.f32 %v1095_v36, %v903_v5 }
 0x252   :  { %1873 = vmatprep.mubr.f32.mxu0 %v1159_v42 }
 0x253   :  { %1874 = vmatmul.mubr.f32.gmra.mrb[14].mxu0 %v1158_v63 }
 0x30a   :  { %v1833_v50 = vpop.f32.mrb[0].mxu0 }
 0x30b   :  { %v2507_v54 = vadd.f32 %v1833_v50, %v3318_v1  ;;  %v1835_v9 = vpop.f32.mrb[1].mxu0 }
 0x30c   :  { %v2508_v51 = vadd.f32 %v1835_v9, %v3322_v38 }
 0x30d   :  { %v1896_v11 = vmul.f32 0.70710677, %v2507_v54  ;;  %v1880_v29 = vmul.f32 0.5, %v2507_v54 }
 0x30e   :  { %v1897_v22 = vmul.f32 0.70710677, %v2508_v51  ;;  %v1839_v3 = vpop.f32.mrb[2].mxu0  ;;  %v1881_v40 = vmul.f32 0.5, %v2508_v51 }
 0x30f   :  { %2708 = verf.f32 %v1896_v11  ;;  %v2509_v62 = vadd.f32 %v1839_v3, %v3318_v1  ;;  %v1841_v12 = vpop.f32.mrb[3].mxu0 }
 0x310   :  { %2710 = verf.f32 %v1897_v22  ;;  %v2510_v16 = vadd.f32 %v1841_v12, %v3322_v38 }
 0x311   :  { %v1898_v7 = vmul.f32 0.70710677, %v2509_v62  ;;  %v1882_v18 = vmul.f32 0.5, %v2509_v62 }
 0x312   :  { %v1899_v13 = vmul.f32 0.70710677, %v2510_v16  ;;  %v1845_v19 = vpop.f32.mrb[4].mxu0  ;;  %v1883_v52 = vmul.f32 0.5, %v2510_v16 }
 0x313   :  { %2712 = verf.f32 %v1898_v7  ;;  %v2511_v2 = vadd.f32 %v1845_v19, %v3318_v1  ;;  %v1847_v60 = vpop.f32.mrb[5].mxu0 }
 0x314   :  { %2714 = verf.f32 %v1899_v13  ;;  %v2512_v46 = vadd.f32 %v1847_v60, %v3322_v38 }
 0x315   :  { %v1900_v58 = vmul.f32 0.70710677, %v2511_v2  ;;  %v1884_v41 = vmul.f32 0.5, %v2511_v2 }
 0x316   :  { %v1901_v14 = vmul.f32 0.70710677, %v2512_v46  ;;  %v1851_v25 = vpop.f32.mrb[6].mxu0  ;;  %v1885_v36 = vmul.f32 0.5, %v2512_v46 }
 0x317   :  { %2716 = verf.f32 %v1900_v58  ;;  %v2513_v20 = vadd.f32 %v1851_v25, %v3318_v1  ;;  %v1853_v4 = vpop.f32.mrb[7].mxu0 }
 0x318   :  { %2718 = verf.f32 %v1901_v14  ;;  %v2514_v27 = vadd.f32 %v1853_v4, %v3322_v38 }
 0x319   :  { %v2709_v28 = vpop.eup %2708  ;;  %v1902_v6 = vmul.f32 0.70710677, %v2513_v20  ;;  %v1886_v22 = vmul.f32 0.5, %v2513_v20 }
 0x31a   :  { %v2711_v21 = vpop.eup %2710  ;;  %v1928_v49 = vadd.f32 1.0, %v2709_v28  ;;  %v1903_v26 = vmul.f32 0.70710677, %v2514_v27  ;;  %v1857_v32 = vpop.f32.mrb[8].mxu0  ;;  %v1887_v16 = vmul.f32 0.5, %v2514_v27 }
 0x31b   :  { %v1929_v30 = vadd.f32 1.0, %v2711_v21  ;;  %2720 = verf.f32 %v1902_v6  ;;  %v3333_v10 = vadd.f32 %v1857_v32, %v3318_v1  ;;  %v1859_v31 = vpop.f32.mrb[9].mxu0 }
 0x31c   :  { %v1944_v8 = vmul.f32 %v1928_v49, %v1880_v29  ;;  %2722 = verf.f32 %v1903_v26  ;;  %v3336_v48 = vadd.f32 %v1859_v31, %v3322_v38 }
 0x31d   :  { %v2713_v0 = vpop.eup %2712  ;;  %v1945_v15 = vmul.f32 %v1929_v30, %v1881_v40  ;;  %v1904_v53 = vmul.f32 0.70710677, %v3333_v10  ;;  %v1888_v20 = vmul.f32 0.5, %v3333_v10 }
 0x31e   :  { %v2715_v35 = vpop.eup %2714  ;;  %1960 = vst [vmem:[#allocation10] sm:$0xff] %v1944_v8  ;;  %v1930_v34 = vadd.f32 1.0, %v2713_v0  ;;  %v1905_v23 = vmul.f32 0.70710677, %v3336_v48  ;;  %v1863_v17 = vpop.f32.mrb[10].mxu0  ;;  %v1889_v27 = vmul.f32 0.5, %v3336_v48 }
 0x31f   :  { %1961 = vst [vmem:[#allocation10 + $0x8] sm:$0xff] %v1945_v15  ;;  %v1931_v45 = vadd.f32 1.0, %v2715_v35  ;;  %2724 = verf.f32 %v1904_v53  ;;  %v2517_v55 = vadd.f32 %v1863_v17, %v3318_v1  ;;  %v1865_v56 = vpop.f32.mrb[11].mxu0 }
 0x320   :  { %v1946_v24 = vmul.f32 %v1930_v34, %v1882_v18  ;;  %2726 = verf.f32 %v1905_v23  ;;  %v2518_v44 = vadd.f32 %v1865_v56, %v3322_v38 }
 0x321   :  { %v2717_v39 = vpop.eup %2716  ;;  %v1947_v57 = vmul.f32 %v1931_v45, %v1883_v52  ;;  %v1906_v59 = vmul.f32 0.70710677, %v2517_v55 }
 0x322   :  { %v2719_v33 = vpop.eup %2718  ;;  %1962 = vst [vmem:[#allocation10 + $0x10] sm:$0xff] %v1946_v24  ;;  %v1932_v43 = vadd.f32 1.0, %v2717_v39  ;;  %v1907_v61 = vmul.f32 0.70710677, %v2518_v44  ;;  %v1869_v5 = vpop.f32.mrb[12].mxu0  ;;  %v1891_v32 = vmul.f32 0.5, %v2518_v44 }
 0x323   :  { %1963 = vst [vmem:[#allocation10 + $0x18] sm:$0xff] %v1947_v57  ;;  %v1933_v37 = vadd.f32 1.0, %v2719_v33  ;;  %2728 = verf.f32 %v1906_v59  ;;  %v2519_v42 = vadd.f32 %v1869_v5, %v3318_v1  ;;  %v1871_v63 = vpop.f32.mrb[13].mxu0 }
 0x324   :  { %v1948_v47 = vmul.f32 %v1932_v43, %v1884_v41  ;;  %2730 = verf.f32 %v1907_v61  ;;  %v2520_v50 = vadd.f32 %v1871_v63, %v3322_v38 }
 0x325   :  { %v2721_v54 = vpop.eup %2720  ;;  %v1949_v9 = vmul.f32 %v1933_v37, %v1885_v36  ;;  %v1908_v51 = vmul.f32 0.70710677, %v2519_v42  ;;  %v1892_v0 = vmul.f32 0.5, %v2519_v42 }
 0x326   :  { %v2723_v11 = vpop.eup %2722  ;;  %1964 = vst [vmem:[#allocation10 + $0x20] sm:$0xff] %v1948_v47  ;;  %v1934_v3 = vadd.f32 1.0, %v2721_v54  ;;  %v1909_v62 = vmul.f32 0.70710677, %v2520_v50  ;;  %v1875_v12 = vpop.f32.mrb[14].mxu0  ;;  %v1893_v15 = vmul.f32 0.5, %v2520_v50 }
 0x327   :  { %1965 = vst [vmem:[#allocation10 + $0x28] sm:$0xff] %v1949_v9  ;;  %v1935_v7 = vadd.f32 1.0, %v2723_v11  ;;  %2732 = verf.f32 %v1908_v51  ;;  %v2521_v13 = vadd.f32 %v1875_v12, %v3318_v1  ;;  %v1877_v19 = vpop.f32.mrb[15].mxu0 }
 0x328   :  { %v1950_v2 = vmul.f32 %v1934_v3, %v1886_v22  ;;  %2734 = verf.f32 %v1909_v62  ;;  %v2522_v60 = vadd.f32 %v1877_v19, %v3322_v38  ;;  %v1890_v38 = vmul.f32 0.5, %v2517_v55 }
 0x329   :  { %v2725_v46 = vpop.eup %2724  ;;  %v1951_v58 = vmul.f32 %v1935_v7, %v1887_v16  ;;  %v1910_v14 = vmul.f32 0.70710677, %v2521_v13  ;;  %v1894_v17 = vmul.f32 0.5, %v2521_v13 }
 0x32a   :  { %v2727_v25 = vpop.eup %2726  ;;  %1966 = vst [vmem:[#allocation10 + $0x30] sm:$0xff] %v1950_v2  ;;  %v1936_v4 = vadd.f32 1.0, %v2725_v46  ;;  %v1911_v28 = vmul.f32 0.70710677, %v2522_v60  ;;  %v1895_v45 = vmul.f32 0.5, %v2522_v60 }
 0x32b   :  { %1967 = vst [vmem:[#allocation10 + $0x38] sm:$0xff] %v1951_v58  ;;  %v1937_v6 = vadd.f32 1.0, %v2727_v25  ;;  %2736 = verf.f32 %v1910_v14 }
 0x32c   :  { %v1952_v1 = vmul.f32 %v1936_v4, %v1888_v20  ;;  %2738 = verf.f32 %v1911_v28 }
 0x32d   :  { %v2729_v21 = vpop.eup %2728  ;;  %v1953_v29 = vmul.f32 %v1937_v6, %v1889_v27 }
 0x32e   :  { %v2731_v49 = vpop.eup %2730  ;;  %1968 = vst [vmem:[#allocation10 + $0x40] sm:$0xff] %v1952_v1  ;;  %v1938_v26 = vadd.f32 1.0, %v2729_v21 }
 0x32f   :  { %1969 = vst [vmem:[#allocation10 + $0x48] sm:$0xff] %v1953_v29  ;;  %v1939_v40 = vadd.f32 1.0, %v2731_v49 }
 0x330   :  { %v1954_v30 = vmul.f32 %v1938_v26, %v1890_v38 }
 0x331   :  { %v2733_v10 = vpop.eup %2732  ;;  %v1955_v31 = vmul.f32 %v1939_v40, %v1891_v32 }
 0x332   :  { %v2735_v8 = vpop.eup %2734  ;;  %1970 = vst [vmem:[#allocation10 + $0x50] sm:$0xff] %v1954_v30  ;;  %v1940_v48 = vadd.f32 1.0, %v2733_v10 }
 0x333   :  { %1971 = vst [vmem:[#allocation10 + $0x58] sm:$0xff] %v1955_v31  ;;  %v1941_v53 = vadd.f32 1.0, %v2735_v8 }
 0x334   :  { %v1956_v35 = vmul.f32 %v1940_v48, %v1892_v0 }
 0x335   :  { %v2737_v18 = vpop.eup %2736  ;;  %v1957_v34 = vmul.f32 %v1941_v53, %v1893_v15 }
 0x336   :  { %v2739_v23 = vpop.eup %2738  ;;  %1972 = vst [vmem:[#allocation10 + $0x60] sm:$0xff] %v1956_v35  ;;  %v1942_v52 = vadd.f32 1.0, %v2737_v18 }
 0x337   :  { %1973 = vst [vmem:[#allocation10 + $0x68] sm:$0xff] %v1957_v34  ;;  %v1943_v55 = vadd.f32 1.0, %v2739_v23 }
 0x338   :  { %v1958_v56 = vmul.f32 %v1942_v52, %v1894_v17 }
 0x339   :  { %v1959_v24 = vmul.f32 %v1943_v55, %v1895_v45 }
 0x33a   :  { %1974 = vst [vmem:[#allocation10 + $0x70] sm:$0xff] %v1958_v56 }
 0x33b   :  { %1975 = vst [vmem:[#allocation10 + $0x78] sm:$0xff] %v1959_v24 }
 0x33c   :  { %2856 = shalt.err (!%p2853_p8)
}
 0x33d   :  { %s2857_s23 = scalar_lea.hbm %s3368_s5, 2048 }
 0x33e   :  { %p2858_p9 = scmp.ne.s32.totalorder %s3368_s5, %s2857_s23  ;;  %p2861_p10 = scmp.lt.u32.totalorder %s2857_s23, %s3368_s5 }
 0x340   :  { %p2863_p11 = pnand %p2861_p10, %p2858_p9 }
 0x342   :  { %2866 = shalt.err (!%p2863_p11)
}
 0x343   :  { %1987 = dma.vmem_to_hbm [thread:$0]  %s1982_s19, 2048, %s3368_s5, [#allocation4], %s2879_s1, %s2879_s1, %s2880_s17  }
 0x344   :  { %2873 = dma.done.wait [#allocation4], 2048  }
 0x345   :  { %2874 = vsyncadd [#allocation4], 4294965248 }
 0x346   :  { %1991 = vsyncpa [#allocation3], 1 }
 0x347   :  { %1992 = vsyncpa [#allocation6], 1 }
 0x348   :  { %1993 = vsyncpa [#allocation9], 1 }
 0x349   :  { %1994 = vsyncpa [#allocation4], 1 }

</bundles_post_ra>
